<compile_context>
chip_gen: v5e
topology: v5e:2x2
jax: 0.10.0
libtpu: 0.0.40
codegen_flags: <defaults>
</compile_context>

<pallas_src>
import jax
import jax.numpy as jnp
from jax.experimental import pallas as pl
from jax.experimental.pallas import tpu as pltpu

HIDDEN = 128  # fixed by the module: Linear(L,128), 128->128, 128->128, 128->1


def _round_up(v, m):
    return ((v + m - 1) // m) * m


def _make_kernel(tb, tn, compute_dtype):
    def kernel(x_ref, w1_ref, w2_ref, w3_ref, w4_ref, o_ref,
               m1_sc, m2_sc, m3_sc):
        # x_ref : (tb, tn, L) instance tile of a bag tile, compute_dtype
        # w1_ref: (L, 128), w2_ref/w3_ref: (128, 128)     compute_dtype
        # w4_ref: (1, 128)                                float32
        # o_ref : (tb, 1)  per-bag sigmoid outputs (written on the last ki step)
        # m*_sc : (tb, 128) f32 running per-layer instance maxes
        ki = pl.program_id(1)

        @pl.when(ki == 0)
        def _init():
            # ReLU outputs are >= 0, so 0 is a valid identity for the max.
            m1_sc[...] = jnp.zeros_like(m1_sc)
            m2_sc[...] = jnp.zeros_like(m2_sc)
            m3_sc[...] = jnp.zeros_like(m3_sc)

        l = x_ref.shape[-1]
        x = x_ref[...].reshape(tb * tn, l)   # big MXU M dim; layout-free (tn%8==0)

        # MXU matmuls accumulate in f32; ReLU / instance-max run in
        # compute_dtype (bf16 halves VPU + XLU-reduce work on v6e/v7x).
        h1 = jnp.maximum(
            jnp.dot(x, w1_ref[...], preferred_element_type=jnp.float32)
            .astype(compute_dtype), 0)
        m1_sc[...] = jnp.maximum(
            m1_sc[...],
            jnp.max(h1.reshape(tb, tn, HIDDEN), axis=1).astype(jnp.float32))

        h2 = jnp.maximum(
            jnp.dot(h1, w2_ref[...], preferred_element_type=jnp.float32)
            .astype(compute_dtype), 0)
        m2_sc[...] = jnp.maximum(
            m2_sc[...],
            jnp.max(h2.reshape(tb, tn, HIDDEN), axis=1).astype(jnp.float32))

        h3 = jnp.maximum(
            jnp.dot(h2, w3_ref[...], preferred_element_type=jnp.float32)
            .astype(compute_dtype), 0)
        m3_sc[...] = jnp.maximum(
            m3_sc[...],
            jnp.max(h3.reshape(tb, tn, HIDDEN), axis=1).astype(jnp.float32))

        @pl.when(ki == pl.num_programs(1) - 1)
        def _finalize():
            pooled = m1_sc[...] + m2_sc[...] + m3_sc[...]          # (tb,128) f32
            # 128 -> 1 projection as an f32 mul + lane reduce: no pooled
            # transpose through the XLU, no skinny MXU matmul.
            logit = jnp.sum(pooled * w4_ref[...], axis=1, keepdims=True)
            o_ref[...] = jax.nn.sigmoid(logit)

    return kernel


def _vmem_capacity_bytes(default=64 * 1024 * 1024):
    """Physical per-core VMEM; falls back to the smallest (v7x) if unknown."""
    try:
        return int(getattr(pltpu.get_tpu_info(), "vmem_capacity_bytes", default))
    except Exception:
        return default


def _est_vmem_bytes(tb, tn, L, isz):
    """Rough per-step live-VMEM estimate used by the tile selection."""
    rows = tb * tn
    x_bytes = 2 * rows * L * isz                           # double-buffered x tile
    w_bytes = 2 * ((L + 2 * HIDDEN) * HIDDEN * isz + HIDDEN * 4)
    h_bytes = rows * HIDDEN * (2 * isz + 8)                # h tiles + f32 MXU acc slack
    s_bytes = 3 * tb * HIDDEN * 4 + 2 * tb * 4             # running-max scratch + out
    return x_bytes + w_bytes + h_bytes + s_bytes


def mi_net_res_bag_probs(x, w1, w2, w3, w4, *, compute_dtype=jnp.bfloat16,
                         row_target=4096, instance_tile=None):
    """Per-bag sigmoid probabilities, shape (B,).

    x : (B, N, L) bags of N instances with L features.
    w1: (128, L), w2/w3: (128, 128), w4: (1, 128)   -- torch (out, in) layout.
    compute_dtype: MXU-operand / ReLU / max dtype (bf16 default; f32 = exact).
    """
    B, N, L = x.shape
    isz = jnp.dtype(compute_dtype).itemsize

    # --- VMEM budget: scoped limit derived from the chip's physical VMEM. ----
    vmem_cap = _vmem_capacity_bytes()
    vmem_limit = min((vmem_cap * 3) // 4, 100 * 1024 * 1024)
    budget = (vmem_limit * 2) // 3          # headroom for compiler scratch/spills

    # --- Tile selection: aim for ~row_target MXU rows (tb*tn) per grid step. --
    n8 = _round_up(N, 8)
    if instance_tile is not None:
        tn = min(n8, _round_up(max(instance_tile, 8), 8))
    else:
        tn = min(n8, max(8, _round_up(row_target // 8, 8)))
    tb = max(8, row_target // tn)           # bags per step
    if B <= 8:
        tb = 8
    elif B * n8 >= 1024:
        # >= 2 bag tiles so the "parallel" bag axis can use both v7x TensorCores.
        tb = min(tb, _round_up(pl.cdiv(B, 2), 8))
    else:
        tb = min(tb, _round_up(B, 8))       # tiny problem: one step is fine
    tb = _round_up(tb, 8)
    # Shrink tiles if the estimated live set exceeds the VMEM budget
    # (only triggers for very large L or N).
    while tb > 8 and _est_vmem_bytes(tb, tn, L, isz) > budget:
        tb = max(8, _round_up(tb // 2, 8))
    while tn > 8 and _est_vmem_bytes(tb, tn, L, isz) > budget:
        tn = max(8, _round_up(tn // 2, 8))
    # TODO(synk): tile the feature dim L as well for extremely large L.

    n_pad = _round_up(N, tn)
    b_pad = _round_up(B, tb)
    grid_b, grid_k = b_pad // tb, n_pad // tn

    # Zero padding is exact: padded rows stay 0 through the ReLUs, ReLU outputs
    # are >= 0 so zeros never win the instance max, and padded bags are sliced
    # off below.  Skip the pad/cast pre-pass entirely when shapes already align.
    if (b_pad, n_pad) != (B, N):
        xp = jnp.pad(x.astype(compute_dtype),
                     ((0, b_pad - B), (0, n_pad - N), (0, 0)))
    else:
        xp = x.astype(compute_dtype)

    # torch (out, in) -> (in, out) for in-kernel x @ W; MXU operands in compute_dtype.
    w1t = jnp.asarray(w1, jnp.float32).T.astype(compute_dtype)
    w2t = jnp.asarray(w2, jnp.float32).T.astype(compute_dtype)
    w3t = jnp.asarray(w3, jnp.float32).T.astype(compute_dtype)
    w4f = jnp.asarray(w4, jnp.float32)                     # (1, 128) f32

    def _build(weight_mode):
        def wspec(shape):
            kw = {} if weight_mode is None else {"pipeline_mode": weight_mode}
            return pl.BlockSpec(shape, lambda b, k: (0,) * len(shape), **kw)

        return pl.pallas_call(
            _make_kernel(tb, tn, compute_dtype),
            out_shape=jax.ShapeDtypeStruct((b_pad, 1), jnp.float32),
            grid=(grid_b, grid_k),
            in_specs=[
                pl.BlockSpec((tb, tn, L), lambda b, k: (b, k, 0)),  # bag/inst tile
                wspec((L, HIDDEN)),      # constant index maps -> fetched once
                wspec((HIDDEN, HIDDEN)),
                wspec((HIDDEN, HIDDEN)),
                wspec((1, HIDDEN)),
            ],
            out_specs=pl.BlockSpec((tb, 1), lambda b, k: (b, 0)),
            scratch_shapes=[pltpu.VMEM((tb, HIDDEN), jnp.float32)] * 3,
            compiler_params=pltpu.CompilerParams(
                dimension_semantics=("parallel", "arbitrary"),
                vmem_limit_bytes=vmem_limit),
        )

    try:
        # Constant weights never change across grid steps: request 1 buffer.
        out = _build(pl.Buffered(1))(xp, w1t, w2t, w3t, w4f)
    except Exception:
        # pipeline_mode=pl.Buffered(1) unsupported on this jax version ->
        # default double-buffered weight tiles (costs ~100-200 KiB of VMEM).
        out = _build(None)(xp, w1t, w2t, w3t, w4f)

    return out[:B, 0]


def mi_net_res_forward(x, w1, w2, w3, w4, **kwargs):
    """Matches MI_net_Res.forward: Sigmoid(linear4(pooled)[0]) -> shape (1,).

    (Like the PyTorch module, every bag is pushed through the pooling + final
    projection; only bag 0's value is returned.)"""
    return mi_net_res_bag_probs(x, w1, w2, w3, w4, **kwargs)[:1]


def _reference_bag_probs(x, w1, w2, w3, w4, compute_dtype=jnp.float32):
    """Pure-JAX mirror of the kernel recipe (exact PyTorch math when f32)."""
    c = lambda a: a.astype(compute_dtype)
    h1 = jnp.maximum(jnp.einsum("bnl,hl->bnh", c(x), c(w1),
                                preferred_element_type=jnp.float32)
                     .astype(compute_dtype), 0)
    p = jnp.max(h1, axis=1).astype(jnp.float32)
    h2 = jnp.maximum(jnp.einsum("bnh,kh->bnk", h1, c(w2),
                                preferred_element_type=jnp.float32)
                     .astype(compute_dtype), 0)
    p = p + jnp.max(h2, axis=1).astype(jnp.float32)
    h3 = jnp.maximum(jnp.einsum("bnh,kh->bnk", h2, c(w3),
                                preferred_element_type=jnp.float32)
                     .astype(compute_dtype), 0)
    p = p + jnp.max(h3, axis=1).astype(jnp.float32)
    logit = jnp.sum(p * w4.astype(jnp.float32), axis=1)
    return jax.nn.sigmoid(logit)


if __name__ == "__main__":
    def init_linear(k, out_f, in_f):
        # torch.nn.Linear-style uniform init U(-1/sqrt(in), 1/sqrt(in))
        bound = 1.0 / (in_f ** 0.5)
        return jax.random.uniform(k, (out_f, in_f), jnp.float32, -bound, bound)

    def make_case(seed_key, B, N, L):
        ks = jax.random.split(seed_key, 5)
        x = jax.random.normal(ks[0], (B, N, L), jnp.float32)
        return (x,
                init_linear(ks[1], HIDDEN, L),
                init_linear(ks[2], HIDDEN, HIDDEN),
                init_linear(ks[3], HIDDEN, HIDDEN),
                init_linear(ks[4], 1, HIDDEN))

    # Case A: exact f32 compute path vs f32 reference (module semantics, tight tol).
    x, w1, w2, w3, w4 = make_case(jax.random.PRNGKey(0), B=2, N=8, L=32)
    out_f32 = mi_net_res_forward(x, w1, w2, w3, w4, compute_dtype=jnp.float32)
    jax.block_until_ready(out_f32)
    ref_f32 = _reference_bag_probs(x, w1, w2, w3, w4)[:1]
    assert out_f32.shape == (1,), out_f32.shape
    assert jnp.allclose(out_f32, ref_f32, atol=1e-5, rtol=1e-5), (out_f32, ref_f32)

    # Case B: default bf16-operand fast path vs a reference using the same recipe.
    probs_b = mi_net_res_bag_probs(x, w1, w2, w3, w4)
    jax.block_until_ready(probs_b)
    ref_b = _reference_bag_probs(x, w1, w2, w3, w4, jnp.bfloat16)
    assert probs_b.shape == (2,), probs_b.shape
    assert jnp.allclose(probs_b, ref_b, atol=2e-3, rtol=0.0), (probs_b, ref_b)

    # Case C: many bags + ragged N -> multi bag-tile grid (2 "parallel" steps),
    # instance/bag zero-padding, (tb, 1) output blocks.
    xc, c1, c2, c3, c4 = make_case(jax.random.PRNGKey(1), B=200, N=12, L=48)
    probs_c = mi_net_res_bag_probs(xc, c1, c2, c3, c4)
    jax.block_until_ready(probs_c)
    ref_c = _reference_bag_probs(xc, c1, c2, c3, c4, jnp.bfloat16)
    assert probs_c.shape == (200,), probs_c.shape
    assert jnp.allclose(probs_c, ref_c, atol=2e-3, rtol=0.0), (
        float(jnp.max(jnp.abs(probs_c - ref_c))))

    # Case D: force instance-axis tiling (grid_k = 3) to exercise the running-max
    # scratch init / accumulate / finalize path.
    xd, d1, d2, d3, d4 = make_case(jax.random.PRNGKey(2), B=5, N=24, L=32)
    probs_d = mi_net_res_bag_probs(xd, d1, d2, d3, d4, instance_tile=8)
    jax.block_until_ready(probs_d)
    ref_d = _reference_bag_probs(xd, d1, d2, d3, d4, jnp.bfloat16)
    assert probs_d.shape == (5,), probs_d.shape
    assert jnp.allclose(probs_d, ref_d, atol=2e-3, rtol=0.0), (
        float(jnp.max(jnp.abs(probs_d - ref_d))))

    print("KERNEL_OK")
</pallas_src>

<mosaic_0001>
module attributes {stable_mosaic.version = 11 : i64} {
  func.func @kernel(%arg0: i32, %arg1: i32, %arg2: memref<8x8x32xf32, #tpu.memory_space<vmem>>, %arg3: memref<32x128xf32, #tpu.memory_space<vmem>>, %arg4: memref<128x128xf32, #tpu.memory_space<vmem>>, %arg5: memref<128x128xf32, #tpu.memory_space<vmem>>, %arg6: memref<1x128xf32, #tpu.memory_space<vmem>>, %arg7: memref<8x1xf32, #tpu.memory_space<vmem>>, %arg8: memref<8x128xf32, #tpu.memory_space<vmem>>, %arg9: memref<8x128xf32, #tpu.memory_space<vmem>>, %arg10: memref<8x128xf32, #tpu.memory_space<vmem>>) attributes {dimension_semantics = [#tpu.dimension_semantics<parallel>, #tpu.dimension_semantics<arbitrary>], iteration_bounds = array<i64: 1, 1>, scalar_prefetch = 0 : i64, scratch_operands = 3 : i64, tpu.core_type = #tpu.core_type<tc>, window_params = [{transform_indices = @transform_0, window_bounds = array<i64: 8, 8, 32>}, {pipeline_mode = #tpu.pipeline_mode<synchronous>, transform_indices = @transform_1, window_bounds = array<i64: 32, 128>}, {pipeline_mode = #tpu.pipeline_mode<synchronous>, transform_indices = @transform_2, window_bounds = array<i64: 128, 128>}, {pipeline_mode = #tpu.pipeline_mode<synchronous>, transform_indices = @transform_3, window_bounds = array<i64: 128, 128>}, {pipeline_mode = #tpu.pipeline_mode<synchronous>, transform_indices = @transform_4, window_bounds = array<i64: 1, 128>}, {transform_indices = @transform_5, window_bounds = array<i64: 8, 1>}]} {
    %c0_i32 = arith.constant 0 : i32
    %0 = arith.cmpi eq, %arg1, %c0_i32 : i32
    %1 = arith.extui %0 : i1 to i32
    %c0_i32_0 = arith.constant 0 : i32
    %2 = arith.cmpi ne, %1, %c0_i32_0 : i32
    scf.if %2 {
      %cst_31 = arith.constant 0.000000e+00 : f32
      %35 = vector.broadcast %cst_31 : f32 to vector<8x128xf32>
      %c0_32 = arith.constant 0 : index
      %c0_33 = arith.constant 0 : index
      %36 = vector.load %arg8[%c0_32, %c0_33] : memref<8x128xf32, #tpu.memory_space<vmem>>, vector<8x128xf32>
      tpu.vector_store %arg8[%c0_32, %c0_33], %35 {strides = array<i32>} : memref<8x128xf32, #tpu.memory_space<vmem>>, vector<8x128xf32>,
      %cst_34 = arith.constant 0.000000e+00 : f32
      %37 = vector.broadcast %cst_34 : f32 to vector<8x128xf32>
      %c0_35 = arith.constant 0 : index
      %c0_36 = arith.constant 0 : index
      %38 = vector.load %arg9[%c0_35, %c0_36] : memref<8x128xf32, #tpu.memory_space<vmem>>, vector<8x128xf32>
      tpu.vector_store %arg9[%c0_35, %c0_36], %37 {strides = array<i32>} : memref<8x128xf32, #tpu.memory_space<vmem>>, vector<8x128xf32>,
      %cst_37 = arith.constant 0.000000e+00 : f32
      %39 = vector.broadcast %cst_37 : f32 to vector<8x128xf32>
      %c0_38 = arith.constant 0 : index
      %c0_39 = arith.constant 0 : index
      %40 = vector.load %arg10[%c0_38, %c0_39] : memref<8x128xf32, #tpu.memory_space<vmem>>, vector<8x128xf32>
      tpu.vector_store %arg10[%c0_38, %c0_39], %39 {strides = array<i32>} : memref<8x128xf32, #tpu.memory_space<vmem>>, vector<8x128xf32>,
    } else {
    }
    %c0 = arith.constant 0 : index
    %c0_1 = arith.constant 0 : index
    %c0_2 = arith.constant 0 : index
    %3 = vector.load %arg2[%c0, %c0_1, %c0_2] : memref<8x8x32xf32, #tpu.memory_space<vmem>>, vector<8x8x32xf32>
    %4 = vector.shape_cast %3 : vector<8x8x32xf32> to vector<64x32xf32>
    %c0_3 = arith.constant 0 : index
    %c0_4 = arith.constant 0 : index
    %5 = vector.load %arg3[%c0_3, %c0_4] : memref<32x128xf32, #tpu.memory_space<vmem>>, vector<32x128xf32>
    %cst = arith.constant dense<0.000000e+00> : vector<64x128xf32>
    %6 = tpu.matmul %4, %5, %cst {dimension_numbers = #tpu.dot_dimension_numbers<[1], [0], [0], [1], [0, 0, 1, 1], [], []>} : vector<64x32xf32>, vector<32x128xf32>, vector<64x128xf32> -> vector<64x128xf32>
    %cst_5 = arith.constant 0.000000e+00 : f32
    %7 = vector.broadcast %cst_5 : f32 to vector<64x128xf32>
    %8 = arith.maximumf %6, %7 : vector<64x128xf32>
    %c0_6 = arith.constant 0 : index
    %c0_7 = arith.constant 0 : index
    %9 = vector.load %arg8[%c0_6, %c0_7] : memref<8x128xf32, #tpu.memory_space<vmem>>, vector<8x128xf32>
    %10 = vector.shape_cast %8 : vector<64x128xf32> to vector<8x8x128xf32>
    %cst_8 = arith.constant dense<0xFF800000> : vector<8x128xf32>
    %11 = vector.multi_reduction <maximumf>, %10, %cst_8 [1] : vector<8x8x128xf32> to vector<8x128xf32>
    %12 = arith.maximumf %9, %11 : vector<8x128xf32>
    %c0_9 = arith.constant 0 : index
    %c0_10 = arith.constant 0 : index
    %13 = vector.load %arg8[%c0_9, %c0_10] : memref<8x128xf32, #tpu.memory_space<vmem>>, vector<8x128xf32>
    tpu.vector_store %arg8[%c0_9, %c0_10], %12 {strides = array<i32>} : memref<8x128xf32, #tpu.memory_space<vmem>>, vector<8x128xf32>,
    %c0_11 = arith.constant 0 : index
    %c0_12 = arith.constant 0 : index
    %14 = vector.load %arg4[%c0_11, %c0_12] : memref<128x128xf32, #tpu.memory_space<vmem>>, vector<128x128xf32>
    %cst_13 = arith.constant dense<0.000000e+00> : vector<64x128xf32>
    %15 = tpu.matmul %8, %14, %cst_13 {dimension_numbers = #tpu.dot_dimension_numbers<[1], [0], [0], [1], [0, 0, 1, 1], [], []>} : vector<64x128xf32>, vector<128x128xf32>, vector<64x128xf32> -> vector<64x128xf32>
    %cst_14 = arith.constant 0.000000e+00 : f32
    %16 = vector.broadcast %cst_14 : f32 to vector<64x128xf32>
    %17 = arith.maximumf %15, %16 : vector<64x128xf32>
    %c0_15 = arith.constant 0 : index
    %c0_16 = arith.constant 0 : index
    %18 = vector.load %arg9[%c0_15, %c0_16] : memref<8x128xf32, #tpu.memory_space<vmem>>, vector<8x128xf32>
    %19 = vector.shape_cast %17 : vector<64x128xf32> to vector<8x8x128xf32>
    %cst_17 = arith.constant dense<0xFF800000> : vector<8x128xf32>
    %20 = vector.multi_reduction <maximumf>, %19, %cst_17 [1] : vector<8x8x128xf32> to vector<8x128xf32>
    %21 = arith.maximumf %18, %20 : vector<8x128xf32>
    %c0_18 = arith.constant 0 : index
    %c0_19 = arith.constant 0 : index
    %22 = vector.load %arg9[%c0_18, %c0_19] : memref<8x128xf32, #tpu.memory_space<vmem>>, vector<8x128xf32>
    tpu.vector_store %arg9[%c0_18, %c0_19], %21 {strides = array<i32>} : memref<8x128xf32, #tpu.memory_space<vmem>>, vector<8x128xf32>,
    %c0_20 = arith.constant 0 : index
    %c0_21 = arith.constant 0 : index
    %23 = vector.load %arg5[%c0_20, %c0_21] : memref<128x128xf32, #tpu.memory_space<vmem>>, vector<128x128xf32>
    %cst_22 = arith.constant dense<0.000000e+00> : vector<64x128xf32>
    %24 = tpu.matmul %17, %23, %cst_22 {dimension_numbers = #tpu.dot_dimension_numbers<[1], [0], [0], [1], [0, 0, 1, 1], [], []>} : vector<64x128xf32>, vector<128x128xf32>, vector<64x128xf32> -> vector<64x128xf32>
    %cst_23 = arith.constant 0.000000e+00 : f32
    %25 = vector.broadcast %cst_23 : f32 to vector<64x128xf32>
    %26 = arith.maximumf %24, %25 : vector<64x128xf32>
    %c0_24 = arith.constant 0 : index
    %c0_25 = arith.constant 0 : index
    %27 = vector.load %arg10[%c0_24, %c0_25] : memref<8x128xf32, #tpu.memory_space<vmem>>, vector<8x128xf32>
    %28 = vector.shape_cast %26 : vector<64x128xf32> to vector<8x8x128xf32>
    %cst_26 = arith.constant dense<0xFF800000> : vector<8x128xf32>
    %29 = vector.multi_reduction <maximumf>, %28, %cst_26 [1] : vector<8x8x128xf32> to vector<8x128xf32>
    %30 = arith.maximumf %27, %29 : vector<8x128xf32>
    %c0_27 = arith.constant 0 : index
    %c0_28 = arith.constant 0 : index
    %31 = vector.load %arg10[%c0_27, %c0_28] : memref<8x128xf32, #tpu.memory_space<vmem>>, vector<8x128xf32>
    tpu.vector_store %arg10[%c0_27, %c0_28], %30 {strides = array<i32>} : memref<8x128xf32, #tpu.memory_space<vmem>>, vector<8x128xf32>,
    %c0_i32_29 = arith.constant 0 : i32
    %32 = arith.cmpi eq, %arg1, %c0_i32_29 : i32
    %33 = arith.extui %32 : i1 to i32
    %c0_i32_30 = arith.constant 0 : i32
    %34 = arith.cmpi ne, %33, %c0_i32_30 : i32
    scf.if %34 {
      %c0_31 = arith.constant 0 : index
      %c0_32 = arith.constant 0 : index
      %35 = vector.load %arg8[%c0_31, %c0_32] : memref<8x128xf32, #tpu.memory_space<vmem>>, vector<8x128xf32>
      %c0_33 = arith.constant 0 : index
      %c0_34 = arith.constant 0 : index
      %36 = vector.load %arg9[%c0_33, %c0_34] : memref<8x128xf32, #tpu.memory_space<vmem>>, vector<8x128xf32>
      %37 = arith.addf %35, %36 : vector<8x128xf32>
      %c0_35 = arith.constant 0 : index
      %c0_36 = arith.constant 0 : index
      %38 = vector.load %arg10[%c0_35, %c0_36] : memref<8x128xf32, #tpu.memory_space<vmem>>, vector<8x128xf32>
      %39 = arith.addf %37, %38 : vector<8x128xf32>
      %c0_37 = arith.constant 0 : index
      %c0_38 = arith.constant 0 : index
      %40 = vector.load %arg6[%c0_37, %c0_38] : memref<1x128xf32, #tpu.memory_space<vmem>>, vector<1x128xf32>
      %41 = vector.broadcast %40 : vector<1x128xf32> to vector<8x128xf32>
      %42 = arith.mulf %39, %41 : vector<8x128xf32>
      %cst_39 = arith.constant dense<0.000000e+00> : vector<8xf32>
      %43 = vector.multi_reduction <add>, %42, %cst_39 [1] : vector<8x128xf32> to vector<8xf32>
      %44 = vector.shape_cast %43 : vector<8xf32> to vector<8x1xf32>
      %45 = arith.negf %44 : vector<8x1xf32>
      %46 = math.exp %45 : vector<8x1xf32>
      %cst_40 = arith.constant 1.000000e+00 : f32
      %47 = vector.broadcast %cst_40 : f32 to vector<8x1xf32>
      %48 = arith.addf %47, %46 : vector<8x1xf32>
      %49 = arith.divf %47, %48 : vector<8x1xf32>
      %c0_41 = arith.constant 0 : index
      %c0_42 = arith.constant 0 : index
      %50 = vector.load %arg7[%c0_41, %c0_42] : memref<8x1xf32, #tpu.memory_space<vmem>>, vector<8x1xf32>
      tpu.vector_store %arg7[%c0_41, %c0_42], %49 {strides = array<i32>} : memref<8x1xf32, #tpu.memory_space<vmem>>, vector<8x1xf32>,
    } else {
    }
    return
  }
  func.func @transform_0(%arg0: i32, %arg1: i32) -> (i32, i32, i32) {
    %c0_i32 = arith.constant 0 : i32
    %c0_i32_0 = arith.constant 0 : i32
    return %arg0, %arg1, %c0_i32 : i32, i32, i32
  }
  func.func @transform_1(%arg0: i32, %arg1: i32) -> (i32, i32) {
    %c0_i32 = arith.constant 0 : i32
    %c0_i32_0 = arith.constant 0 : i32
    %c0_i32_1 = arith.constant 0 : i32
    return %c0_i32, %c0_i32_0 : i32, i32
  }
  func.func @transform_2(%arg0: i32, %arg1: i32) -> (i32, i32) {
    %c0_i32 = arith.constant 0 : i32
    %c0_i32_0 = arith.constant 0 : i32
    %c0_i32_1 = arith.constant 0 : i32
    return %c0_i32, %c0_i32_0 : i32, i32
  }
  func.func @transform_3(%arg0: i32, %arg1: i32) -> (i32, i32) {
    %c0_i32 = arith.constant 0 : i32
    %c0_i32_0 = arith.constant 0 : i32
    %c0_i32_1 = arith.constant 0 : i32
    return %c0_i32, %c0_i32_0 : i32, i32
  }
  func.func @transform_4(%arg0: i32, %arg1: i32) -> (i32, i32) {
    %c0_i32 = arith.constant 0 : i32
    %c0_i32_0 = arith.constant 0 : i32
    %c0_i32_1 = arith.constant 0 : i32
    return %c0_i32, %c0_i32_0 : i32, i32
  }
  func.func @transform_5(%arg0: i32, %arg1: i32) -> (i32, i32) {
    %c0_i32 = arith.constant 0 : i32
    %c0_i32_0 = arith.constant 0 : i32
    return %arg0, %c0_i32 : i32, i32
  }
}

module attributes {stable_mosaic.version = 11 : i64} {
  func.func @kernel(%arg0: i32, %arg1: i32, %arg2: memref<8x8x32xf32, #tpu.memory_space<vmem>>, %arg3: memref<32x128xf32, #tpu.memory_space<vmem>>, %arg4: memref<128x128xf32, #tpu.memory_space<vmem>>, %arg5: memref<128x128xf32, #tpu.memory_space<vmem>>, %arg6: memref<1x128xf32, #tpu.memory_space<vmem>>, %arg7: memref<8x1xf32, #tpu.memory_space<vmem>>, %arg8: memref<8x128xf32, #tpu.memory_space<vmem>>, %arg9: memref<8x128xf32, #tpu.memory_space<vmem>>, %arg10: memref<8x128xf32, #tpu.memory_space<vmem>>) attributes {dimension_semantics = [#tpu.dimension_semantics<parallel>, #tpu.dimension_semantics<arbitrary>], iteration_bounds = array<i64: 1, 1>, scalar_prefetch = 0 : i64, scratch_operands = 3 : i64, tpu.core_type = #tpu.core_type<tc>, window_params = [{transform_indices = @transform_0, window_bounds = array<i64: 8, 8, 32>}, {pipeline_mode = #tpu.pipeline_mode<synchronous>, transform_indices = @transform_1, window_bounds = array<i64: 32, 128>}, {pipeline_mode = #tpu.pipeline_mode<synchronous>, transform_indices = @transform_2, window_bounds = array<i64: 128, 128>}, {pipeline_mode = #tpu.pipeline_mode<synchronous>, transform_indices = @transform_3, window_bounds = array<i64: 128, 128>}, {pipeline_mode = #tpu.pipeline_mode<synchronous>, transform_indices = @transform_4, window_bounds = array<i64: 1, 128>}, {transform_indices = @transform_5, window_bounds = array<i64: 8, 1>}]} {
    %c0_i32 = arith.constant 0 : i32
    %0 = arith.cmpi eq, %arg1, %c0_i32 : i32
    %1 = arith.extui %0 : i1 to i32
    %c0_i32_0 = arith.constant 0 : i32
    %2 = arith.cmpi ne, %1, %c0_i32_0 : i32
    scf.if %2 {
      %cst_31 = arith.constant 0.000000e+00 : f32
      %35 = vector.broadcast %cst_31 : f32 to vector<8x128xf32>
      %c0_32 = arith.constant 0 : index
      %c0_33 = arith.constant 0 : index
      %36 = vector.load %arg8[%c0_32, %c0_33] : memref<8x128xf32, #tpu.memory_space<vmem>>, vector<8x128xf32>
      tpu.vector_store %arg8[%c0_32, %c0_33], %35 {strides = array<i32>} : memref<8x128xf32, #tpu.memory_space<vmem>>, vector<8x128xf32>,
      %cst_34 = arith.constant 0.000000e+00 : f32
      %37 = vector.broadcast %cst_34 : f32 to vector<8x128xf32>
      %c0_35 = arith.constant 0 : index
      %c0_36 = arith.constant 0 : index
      %38 = vector.load %arg9[%c0_35, %c0_36] : memref<8x128xf32, #tpu.memory_space<vmem>>, vector<8x128xf32>
      tpu.vector_store %arg9[%c0_35, %c0_36], %37 {strides = array<i32>} : memref<8x128xf32, #tpu.memory_space<vmem>>, vector<8x128xf32>,
      %cst_37 = arith.constant 0.000000e+00 : f32
      %39 = vector.broadcast %cst_37 : f32 to vector<8x128xf32>
      %c0_38 = arith.constant 0 : index
      %c0_39 = arith.constant 0 : index
      %40 = vector.load %arg10[%c0_38, %c0_39] : memref<8x128xf32, #tpu.memory_space<vmem>>, vector<8x128xf32>
      tpu.vector_store %arg10[%c0_38, %c0_39], %39 {strides = array<i32>} : memref<8x128xf32, #tpu.memory_space<vmem>>, vector<8x128xf32>,
    } else {
    }
    %c0 = arith.constant 0 : index
    %c0_1 = arith.constant 0 : index
    %c0_2 = arith.constant 0 : index
    %3 = vector.load %arg2[%c0, %c0_1, %c0_2] : memref<8x8x32xf32, #tpu.memory_space<vmem>>, vector<8x8x32xf32>
    %4 = vector.shape_cast %3 : vector<8x8x32xf32> to vector<64x32xf32>
    %c0_3 = arith.constant 0 : index
    %c0_4 = arith.constant 0 : index
    %5 = vector.load %arg3[%c0_3, %c0_4] : memref<32x128xf32, #tpu.memory_space<vmem>>, vector<32x128xf32>
    %cst = arith.constant dense<0.000000e+00> : vector<64x128xf32>
    %6 = tpu.matmul %4, %5, %cst {dimension_numbers = #tpu.dot_dimension_numbers<[1], [0], [0], [1], [0, 0, 1, 1], [], []>} : vector<64x32xf32>, vector<32x128xf32>, vector<64x128xf32> -> vector<64x128xf32>
    %cst_5 = arith.constant 0.000000e+00 : f32
    %7 = vector.broadcast %cst_5 : f32 to vector<64x128xf32>
    %8 = arith.maximumf %6, %7 : vector<64x128xf32>
    %c0_6 = arith.constant 0 : index
    %c0_7 = arith.constant 0 : index
    %9 = vector.load %arg8[%c0_6, %c0_7] : memref<8x128xf32, #tpu.memory_space<vmem>>, vector<8x128xf32>
    %10 = vector.shape_cast %8 : vector<64x128xf32> to vector<8x8x128xf32>
    %cst_8 = arith.constant dense<0xFF800000> : vector<8x128xf32>
    %11 = vector.multi_reduction <maximumf>, %10, %cst_8 [1] : vector<8x8x128xf32> to vector<8x128xf32>
    %12 = arith.maximumf %9, %11 : vector<8x128xf32>
    %c0_9 = arith.constant 0 : index
    %c0_10 = arith.constant 0 : index
    %13 = vector.load %arg8[%c0_9, %c0_10] : memref<8x128xf32, #tpu.memory_space<vmem>>, vector<8x128xf32>
    tpu.vector_store %arg8[%c0_9, %c0_10], %12 {strides = array<i32>} : memref<8x128xf32, #tpu.memory_space<vmem>>, vector<8x128xf32>,
    %c0_11 = arith.constant 0 : index
    %c0_12 = arith.constant 0 : index
    %14 = vector.load %arg4[%c0_11, %c0_12] : memref<128x128xf32, #tpu.memory_space<vmem>>, vector<128x128xf32>
    %cst_13 = arith.constant dense<0.000000e+00> : vector<64x128xf32>
    %15 = tpu.matmul %8, %14, %cst_13 {dimension_numbers = #tpu.dot_dimension_numbers<[1], [0], [0], [1], [0, 0, 1, 1], [], []>} : vector<64x128xf32>, vector<128x128xf32>, vector<64x128xf32> -> vector<64x128xf32>
    %cst_14 = arith.constant 0.000000e+00 : f32
    %16 = vector.broadcast %cst_14 : f32 to vector<64x128xf32>
    %17 = arith.maximumf %15, %16 : vector<64x128xf32>
    %c0_15 = arith.constant 0 : index
    %c0_16 = arith.constant 0 : index
    %18 = vector.load %arg9[%c0_15, %c0_16] : memref<8x128xf32, #tpu.memory_space<vmem>>, vector<8x128xf32>
    %19 = vector.shape_cast %17 : vector<64x128xf32> to vector<8x8x128xf32>
    %cst_17 = arith.constant dense<0xFF800000> : vector<8x128xf32>
    %20 = vector.multi_reduction <maximumf>, %19, %cst_17 [1] : vector<8x8x128xf32> to vector<8x128xf32>
    %21 = arith.maximumf %18, %20 : vector<8x128xf32>
    %c0_18 = arith.constant 0 : index
    %c0_19 = arith.constant 0 : index
    %22 = vector.load %arg9[%c0_18, %c0_19] : memref<8x128xf32, #tpu.memory_space<vmem>>, vector<8x128xf32>
    tpu.vector_store %arg9[%c0_18, %c0_19], %21 {strides = array<i32>} : memref<8x128xf32, #tpu.memory_space<vmem>>, vector<8x128xf32>,
    %c0_20 = arith.constant 0 : index
    %c0_21 = arith.constant 0 : index
    %23 = vector.load %arg5[%c0_20, %c0_21] : memref<128x128xf32, #tpu.memory_space<vmem>>, vector<128x128xf32>
    %cst_22 = arith.constant dense<0.000000e+00> : vector<64x128xf32>
    %24 = tpu.matmul %17, %23, %cst_22 {dimension_numbers = #tpu.dot_dimension_numbers<[1], [0], [0], [1], [0, 0, 1, 1], [], []>} : vector<64x128xf32>, vector<128x128xf32>, vector<64x128xf32> -> vector<64x128xf32>
    %cst_23 = arith.constant 0.000000e+00 : f32
    %25 = vector.broadcast %cst_23 : f32 to vector<64x128xf32>
    %26 = arith.maximumf %24, %25 : vector<64x128xf32>
    %c0_24 = arith.constant 0 : index
    %c0_25 = arith.constant 0 : index
    %27 = vector.load %arg10[%c0_24, %c0_25] : memref<8x128xf32, #tpu.memory_space<vmem>>, vector<8x128xf32>
    %28 = vector.shape_cast %26 : vector<64x128xf32> to vector<8x8x128xf32>
    %cst_26 = arith.constant dense<0xFF800000> : vector<8x128xf32>
    %29 = vector.multi_reduction <maximumf>, %28, %cst_26 [1] : vector<8x8x128xf32> to vector<8x128xf32>
    %30 = arith.maximumf %27, %29 : vector<8x128xf32>
    %c0_27 = arith.constant 0 : index
    %c0_28 = arith.constant 0 : index
    %31 = vector.load %arg10[%c0_27, %c0_28] : memref<8x128xf32, #tpu.memory_space<vmem>>, vector<8x128xf32>
    tpu.vector_store %arg10[%c0_27, %c0_28], %30 {strides = array<i32>} : memref<8x128xf32, #tpu.memory_space<vmem>>, vector<8x128xf32>,
    %c0_i32_29 = arith.constant 0 : i32
    %32 = arith.cmpi eq, %arg1, %c0_i32_29 : i32
    %33 = arith.extui %32 : i1 to i32
    %c0_i32_30 = arith.constant 0 : i32
    %34 = arith.cmpi ne, %33, %c0_i32_30 : i32
    scf.if %34 {
      %c0_31 = arith.constant 0 : index
      %c0_32 = arith.constant 0 : index
      %35 = vector.load %arg8[%c0_31, %c0_32] : memref<8x128xf32, #tpu.memory_space<vmem>>, vector<8x128xf32>
      %c0_33 = arith.constant 0 : index
      %c0_34 = arith.constant 0 : index
      %36 = vector.load %arg9[%c0_33, %c0_34] : memref<8x128xf32, #tpu.memory_space<vmem>>, vector<8x128xf32>
      %37 = arith.addf %35, %36 : vector<8x128xf32>
      %c0_35 = arith.constant 0 : index
      %c0_36 = arith.constant 0 : index
      %38 = vector.load %arg10[%c0_35, %c0_36] : memref<8x128xf32, #tpu.memory_space<vmem>>, vector<8x128xf32>
      %39 = arith.addf %37, %38 : vector<8x128xf32>
      %c0_37 = arith.constant 0 : index
      %c0_38 = arith.constant 0 : index
      %40 = vector.load %arg6[%c0_37, %c0_38] : memref<1x128xf32, #tpu.memory_space<vmem>>, vector<1x128xf32>
      %41 = vector.broadcast %40 : vector<1x128xf32> to vector<8x128xf32>
      %42 = arith.mulf %39, %41 : vector<8x128xf32>
      %cst_39 = arith.constant dense<0.000000e+00> : vector<8xf32>
      %43 = vector.multi_reduction <add>, %42, %cst_39 [1] : vector<8x128xf32> to vector<8xf32>
      %44 = vector.shape_cast %43 : vector<8xf32> to vector<8x1xf32>
      %45 = arith.negf %44 : vector<8x1xf32>
      %46 = math.exp %45 : vector<8x1xf32>
      %cst_40 = arith.constant 1.000000e+00 : f32
      %47 = vector.broadcast %cst_40 : f32 to vector<8x1xf32>
      %48 = arith.addf %47, %46 : vector<8x1xf32>
      %49 = arith.divf %47, %48 : vector<8x1xf32>
      %c0_41 = arith.constant 0 : index
      %c0_42 = arith.constant 0 : index
      %50 = vector.load %arg7[%c0_41, %c0_42] : memref<8x1xf32, #tpu.memory_space<vmem>>, vector<8x1xf32>
      tpu.vector_store %arg7[%c0_41, %c0_42], %49 {strides = array<i32>} : memref<8x1xf32, #tpu.memory_space<vmem>>, vector<8x1xf32>,
    } else {
    }
    return
  }
  func.func @transform_0(%arg0: i32, %arg1: i32) -> (i32, i32, i32) {
    %c0_i32 = arith.constant 0 : i32
    %c0_i32_0 = arith.constant 0 : i32
    return %arg0, %arg1, %c0_i32 : i32, i32, i32
  }
  func.func @transform_1(%arg0: i32, %arg1: i32) -> (i32, i32) {
    %c0_i32 = arith.constant 0 : i32
    %c0_i32_0 = arith.constant 0 : i32
    %c0_i32_1 = arith.constant 0 : i32
    return %c0_i32, %c0_i32_0 : i32, i32
  }
  func.func @transform_2(%arg0: i32, %arg1: i32) -> (i32, i32) {
    %c0_i32 = arith.constant 0 : i32
    %c0_i32_0 = arith.constant 0 : i32
    %c0_i32_1 = arith.constant 0 : i32
    return %c0_i32, %c0_i32_0 : i32, i32
  }
  func.func @transform_3(%arg0: i32, %arg1: i32) -> (i32, i32) {
    %c0_i32 = arith.constant 0 : i32
    %c0_i32_0 = arith.constant 0 : i32
    %c0_i32_1 = arith.constant 0 : i32
    return %c0_i32, %c0_i32_0 : i32, i32
  }
  func.func @transform_4(%arg0: i32, %arg1: i32) -> (i32, i32) {
    %c0_i32 = arith.constant 0 : i32
    %c0_i32_0 = arith.constant 0 : i32
    %c0_i32_1 = arith.constant 0 : i32
    return %c0_i32, %c0_i32_0 : i32, i32
  }
  func.func @transform_5(%arg0: i32, %arg1: i32) -> (i32, i32) {
    %c0_i32 = arith.constant 0 : i32
    %c0_i32_0 = arith.constant 0 : i32
    return %arg0, %c0_i32 : i32, i32
  }
}

</mosaic_0001>

<bundles_post_ra>
// kernel: tpu_custom_call.1
= control target key start
LH: loop header
LB: loop body
LE: loop exit
PB: predicated region body
PF: predicated region fallthrough
CT: control target
= control target key end

     0   :  { %10 = vsyncpa [#allocation6], 0  ;;  %s800_s0 = inlined_call_operand.hbm [shape: f32[8,8,32], index: 0, kind: input, shape index: {}]   ;;  %s801_s1 = inlined_call_operand.hbm [shape: f32[32,128], index: 1, kind: input, shape index: {}]   ;;  %s802_s2 = inlined_call_operand.hbm [shape: f32[128,128], index: 2, kind: input, shape index: {}]   ;;  %s803_s3 = inlined_call_operand.hbm [shape: f32[128,128], index: 3, kind: input, shape index: {}]   ;;  %s804_s4 = inlined_call_operand.vmem [shape: f32[1,128], index: 4, kind: input, shape index: {}]   ;;  %s805_s5 = inlined_call_operand.vmem [shape: f32[8,1], index: 5, kind: output, shape index: {}]  }
   0x1   :  { %11 = vsyncpa [#allocation8], 0 }
   0x2   :  { %12 = vsyncpa [#allocation11], 0  ;;  %s30_s20 = sshll.u32 %s801_s1, 4  ;;  %s711_s21 = smov [#allocation7]   ;;  %s31_s20 = int_to_ptr.hbm [resolvable:$true] %s30_s20 }
   0x3   :  { %s32_s22 = sshll.u32 %s711_s21, 4  ;;  %s17_s25 = sshll.u32 %s800_s0, 4  ;;  %s33_s22 = int_to_ptr.vmem [resolvable:$true] %s32_s22  ;;  %s18_s25 = int_to_ptr.hbm [resolvable:$true] %s17_s25 }
   0x4   :  { %s712_s26 = smov 128   ;;  %s713_s27 = smov 8  }
   0x5   :  { %38 = dma.hbm_to_vmem [thread:$0]  %s31_s20, 512, %s33_s22, [#allocation8], %s712_s26, %s712_s26, %s713_s27  }
   0x6   :  { %s714_s28 = smov [#allocation5]   ;;  %s43_s7 = sshll.u32 %s802_s2, 4  ;;  %s44_s7 = int_to_ptr.hbm [resolvable:$true] %s43_s7 }
   0x7   :  { %s19_s29 = sshll.u32 %s714_s28, 4  ;;  %s56_s9 = sshll.u32 %s803_s3, 4  ;;  %s20_s29 = int_to_ptr.vmem [resolvable:$true] %s19_s29  ;;  %s57_s9 = int_to_ptr.hbm [resolvable:$true] %s56_s9 }
   0x8   :  { %25 = dma.hbm_to_vmem [thread:$0]  %s18_s25, 1024, %s20_s29, [#allocation6], %s712_s26, %s712_s26, %s713_s27  }
   0x9   :  { %s715_s10 = smov [#allocation9]   ;;  %s716_s0 = smov [#allocation10]  }
   0xa   :  { %s45_s11 = sshll.u32 %s715_s10, 4  ;;  %s58_s12 = sshll.u32 %s716_s0, 4  ;;  %s46_s11 = int_to_ptr.vmem [resolvable:$true] %s45_s11  ;;  %s59_s12 = int_to_ptr.vmem [resolvable:$true] %s58_s12 }
   0xb   :  { %51 = dma.hbm_to_vmem [thread:$0]  %s44_s7, 2048, %s46_s11, [#allocation8], %s712_s26, %s712_s26, %s713_s27  }
   0xc   :  { %64 = dma.hbm_to_vmem [thread:$0]  %s57_s9, 2048, %s59_s12, [#allocation11], %s712_s26, %s712_s26, %s713_s27  }
   0xd   :  { %705 = dma.done.wait [#allocation6], 1024  }
   0xe   :  { %706 = vsyncadd [#allocation6], 4294966272 }
   0xf   :  { %707 = dma.done.wait [#allocation8], 2560  }
  0x10   :  { %708 = vsyncadd [#allocation8], 4294964736 }
  0x11   :  { %709 = dma.done.wait [#allocation11], 2048  }
  0x12   :  { %710 = vsyncadd [#allocation11], 4294965248  ;;  %v101_v0 = vld [vmem:[#allocation7 + $0x18] sm:$0xff]  ;;  %v100_v1 = vld [vmem:[#allocation7 + $0x10] sm:$0xff]  ;;  %vm102_vm0 = vcmask 261120   ;;  %vm233_vm1 = vcmask 1041409  }
  0x13   :  { %139 = vmatpush.msra.mxu0 %v101_v0  ;;  %v99_v2 = vld [vmem:[#allocation7 + $0x8] sm:$0xff]  ;;  %v98_v3 = vld [vmem:[#allocation7] sm:$0xff]  ;;  %v92_v6 = vld [vmem:[#allocation5 + $0x10] sm:$0xff]  ;;  %vm235_vm2 = vcmask 1042434   ;;  %vm237_vm3 = vcmask 1043459   ;;  %vm239_vm4 = vcmask 1044484  }
  0x14   :  { %v90_v4 = vld [vmem:[#allocation5] sm:$0xff]  ;;  %v91_v5 = vld [vmem:[#allocation5 + $0x8] sm:$0xff]  ;;  %v93_v7 = vld [vmem:[#allocation5 + $0x18] sm:$0xff]  ;;  %vm241_vm5 = vcmask 1045509   ;;  %vm243_vm6 = vcmask 1046534   ;;  %vm245_vm7 = vcmask 1047559  }
  0x15   :  { %140 = vmatpush.msra.mxu0 %v100_v1  ;;  %v265_v8 = vld [vmem:[#allocation9 + $0x78] sm:$0xff]  ;;  %v264_v9 = vld [vmem:[#allocation9 + $0x70] sm:$0xff]  ;;  %v263_v10 = vld [vmem:[#allocation9 + $0x68] sm:$0xff]  ;;  %vm548_vm11 = vcmask 7168  }
  0x16   :  { %266 = vmatpush.msra.mxu1 %v265_v8  ;;  %566 = vmatpush.msra.mxu3 %v265_v8  ;;  %v262_v11 = vld [vmem:[#allocation9 + $0x60] sm:$0xff]  ;;  %v261_v13 = vld [vmem:[#allocation9 + $0x58] sm:$0xff]  ;;  %v260_v14 = vld [vmem:[#allocation9 + $0x50] sm:$0xff] }
  0x17   :  { %141 = vmatpush.msra.mxu0 %v99_v2  ;;  %v94_v12 = vld [vmem:[#allocation5 + $0x20] sm:$0xff]  ;;  %v259_v15 = vld [vmem:[#allocation9 + $0x48] sm:$0xff]  ;;  %v257_v18 = vld [vmem:[#allocation9 + $0x38] sm:$0xff] }
  0x18   :  { %267 = vmatpush.msra.mxu1 %v264_v9  ;;  %567 = vmatpush.msra.mxu3 %v264_v9  ;;  %v258_v16 = vld [vmem:[#allocation9 + $0x40] sm:$0xff]  ;;  %v95_v17 = vld [vmem:[#allocation5 + $0x28] sm:$0xff]  ;;  %v256_v19 = vld [vmem:[#allocation9 + $0x30] sm:$0xff] }
  0x19   :  { %142 = vmatpush.msra.mxu0 %v98_v3  ;;  %v255_v20 = vld [vmem:[#allocation9 + $0x28] sm:$0xff]  ;;  %v254_v21 = vld [vmem:[#allocation9 + $0x20] sm:$0xff]  ;;  %v96_v22 = vld [vmem:[#allocation5 + $0x30] sm:$0xff] }
  0x1a   :  { %557 = vmatmul.msk.f32.vlgmr.msra.gmra.mxu0 %vm102_vm0, %v90_v4  ;;  %268 = vmatpush.msra.mxu1 %v263_v10  ;;  %v253_v23 = vld [vmem:[#allocation9 + $0x18] sm:$0xff]  ;;  %v252_v24 = vld [vmem:[#allocation9 + $0x10] sm:$0xff]  ;;  %v251_v26 = vld [vmem:[#allocation9 + $0x8] sm:$0xff] }
  0x1b   :  { %568 = vmatpush.msra.mxu3 %v263_v10  ;;  %v97_v25 = vld [vmem:[#allocation5 + $0x38] sm:$0xff]  ;;  %v250_v27 = vld [vmem:[#allocation9] sm:$0xff]  ;;  %v396_v3 = vld [vmem:[#allocation10 + $0x70] sm:$0xff] }
  0x1c   :  { %269 = vmatpush.msra.mxu1 %v262_v11  ;;  %v397_v2 = vld [vmem:[#allocation10 + $0x78] sm:$0xff]  ;;  %v394_v10 = vld [vmem:[#allocation10 + $0x60] sm:$0xff] }
  0x1d   :  { %569 = vmatpush.msra.mxu3 %v262_v11  ;;  %398 = vmatpush.msra.mxu2 %v397_v2 }
  0x1e   :  { %270 = vmatpush.msra.mxu1 %v261_v13 }
  0x1f   :  { %570 = vmatpush.msra.mxu3 %v261_v13  ;;  %399 = vmatpush.msra.mxu2 %v396_v3  ;;  %v393_v13 = vld [vmem:[#allocation10 + $0x58] sm:$0xff] }
  0x20   :  { %271 = vmatpush.msra.mxu1 %v260_v14 }
  0x21   :  { %571 = vmatpush.msra.mxu3 %v260_v14 }
  0x22   :  { %558 = vmatmul.msk.f32.gmra.mxu0 %vm102_vm0, %v91_v5  ;;  %272 = vmatpush.msra.mxu1 %v259_v15  ;;  %v395_v5 = vld [vmem:[#allocation10 + $0x68] sm:$0xff] }
  0x23   :  { %572 = vmatpush.msra.mxu3 %v259_v15  ;;  %400 = vmatpush.msra.mxu2 %v395_v5 }
  0x24   :  { %273 = vmatpush.msra.mxu1 %v258_v16 }
  0x25   :  { %573 = vmatpush.msra.mxu3 %v258_v16  ;;  %401 = vmatpush.msra.mxu2 %v394_v10  ;;  %v392_v16 = vld [vmem:[#allocation10 + $0x50] sm:$0xff] }
  0x26   :  { %274 = vmatpush.msra.mxu1 %v257_v18 }
  0x27   :  { %574 = vmatpush.msra.mxu3 %v257_v18  ;;  %402 = vmatpush.msra.mxu2 %v393_v13  ;;  %v391_v18 = vld [vmem:[#allocation10 + $0x48] sm:$0xff] }
  0x28   :  { %275 = vmatpush.msra.mxu1 %v256_v19 }
  0x29   :  { %575 = vmatpush.msra.mxu3 %v256_v19  ;;  %403 = vmatpush.msra.mxu2 %v392_v16 }
  0x2a   :  { %559 = vmatmul.msk.f32.gmra.mxu0 %vm102_vm0, %v92_v6  ;;  %276 = vmatpush.msra.mxu1 %v255_v20 }
  0x2b   :  { %576 = vmatpush.msra.mxu3 %v255_v20  ;;  %404 = vmatpush.msra.mxu2 %v391_v18 }
  0x2c   :  { %277 = vmatpush.msra.mxu1 %v254_v21 }
  0x2d   :  { %577 = vmatpush.msra.mxu3 %v254_v21 }
  0x2e   :  { %278 = vmatpush.msra.mxu1 %v253_v23 }
  0x2f   :  { %578 = vmatpush.msra.mxu3 %v253_v23  ;;  %v390_v23 = vld [vmem:[#allocation10 + $0x40] sm:$0xff] }
  0x30   :  { %279 = vmatpush.msra.mxu1 %v252_v24  ;;  %405 = vmatpush.msra.mxu2 %v390_v23 }
  0x31   :  { %579 = vmatpush.msra.mxu3 %v252_v24 }
  0x32   :  { %560 = vmatmul.msk.f32.gmra.mxu0 %vm102_vm0, %v93_v7  ;;  %280 = vmatpush.msra.mxu1 %v251_v26 }
  0x33   :  { %580 = vmatpush.msra.mxu3 %v251_v26  ;;  %v389_v26 = vld [vmem:[#allocation10 + $0x38] sm:$0xff] }
  0x34   :  { %281 = vmatpush.msra.mxu1 %v250_v27  ;;  %406 = vmatpush.msra.mxu2 %v389_v26 }
  0x35   :  { %581 = vmatpush.msra.mxu3 %v250_v27 }
  0x37   :  { %582 = vmatpush.msrb.mxu3 %v397_v2 }
  0x39   :  { %583 = vmatpush.msrb.mxu3 %v396_v3 }
  0x3a   :  { %561 = vmatmul.msk.f32.gmra.mxu0 %vm102_vm0, %v94_v12 }
  0x3b   :  { %584 = vmatpush.msrb.mxu3 %v395_v5 }
  0x3d   :  { %585 = vmatpush.msrb.mxu3 %v394_v10 }
  0x3f   :  { %586 = vmatpush.msrb.mxu3 %v393_v13 }
  0x41   :  { %587 = vmatpush.msrb.mxu3 %v392_v16 }
  0x42   :  { %562 = vmatmul.msk.f32.gmra.mxu0 %vm102_vm0, %v95_v17 }
  0x43   :  { %588 = vmatpush.msrb.mxu3 %v391_v18 }
  0x45   :  { %589 = vmatpush.msrb.mxu3 %v390_v23 }
  0x47   :  { %590 = vmatpush.msrb.mxu3 %v389_v26 }
  0x4a   :  { %563 = vmatmul.msk.f32.gmra.mxu0 %vm102_vm0, %v96_v22 }
  0x52   :  { %564 = vmatmul.msk.f32.gmra.mxu0 %vm102_vm0, %v97_v25 }
  0x97   :  { %v144_v28 = vpop.f32.mrf.mxu0 }
  0x98   :  { %v168_v29 = vmax.f32 %v144_v28, 0.0 }
  0x9a   :  { %v177_v30 = vrot.slane %v168_v29, 4  ;;  %282 = vmatmul.f32.vlgmr.msra.gmra.mxu1 %v168_v29 }
  0x9c   :  { %v178_v31 = vmax.f32 %v168_v29, %v177_v30  ;;  %v388_v29 = vld [vmem:[#allocation10 + $0x30] sm:$0xff] }
  0x9d   :  { %407 = vmatpush.msra.mxu2 %v388_v29  ;;  %591 = vmatpush.msrb.mxu3 %v388_v29 }
  0x9e   :  { %v179_v33 = vrot.slane %v178_v31, 2 }
  0x9f   :  { %v147_v32 = vpop.f32.mrf.mxu0 }
  0xa0   :  { %v169_v34 = vmax.f32 %v147_v32, 0.0  ;;  %v180_v36 = vmax.f32 %v178_v31, %v179_v33  ;;  %v387_v31 = vld [vmem:[#allocation10 + $0x28] sm:$0xff] }
  0xa1   :  { %408 = vmatpush.msra.mxu2 %v387_v31  ;;  %592 = vmatpush.msrb.mxu3 %v387_v31 }
  0xa2   :  { %v183_v35 = vrot.slane %v169_v34, 4  ;;  %285 = vmatmul.f32.gmra.mxu1 %v169_v34  ;;  %v181_v40 = vrot.slane %v180_v36, 1 }
  0xa4   :  { %v184_v37 = vmax.f32 %v169_v34, %v183_v35  ;;  %v182_v45 = vmax.f32 %v180_v36, %v181_v40  ;;  %v386_v36 = vld [vmem:[#allocation10 + $0x20] sm:$0xff] }
  0xa5   :  { %409 = vmatpush.msra.mxu2 %v386_v36  ;;  %593 = vmatpush.msrb.mxu3 %v386_v36 }
  0xa6   :  { %v185_v38 = vrot.slane %v184_v37, 2 }
  0xa7   :  { %v150_v39 = vpop.f32.mrf.mxu0 }
  0xa8   :  { %v186_v41 = vmax.f32 %v184_v37, %v185_v38  ;;  %v170_v42 = vmax.f32 %v150_v39, 0.0  ;;  %v385_v39 = vld [vmem:[#allocation10 + $0x18] sm:$0xff] }
  0xa9   :  { %410 = vmatpush.msra.mxu2 %v385_v39  ;;  %594 = vmatpush.msrb.mxu3 %v385_v39 }
  0xaa   :  { %v187_v43 = vrot.slane %v186_v41, 1  ;;  %v189_v44 = vrot.slane %v170_v42, 4  ;;  %288 = vmatmul.f32.gmra.mxu1 %v170_v42 }
  0xac   :  { %v188_v46 = vmax.f32 %v186_v41, %v187_v43  ;;  %v190_v47 = vmax.f32 %v170_v42, %v189_v44  ;;  %v384_v42 = vld [vmem:[#allocation10 + $0x10] sm:$0xff] }
  0xad   :  { %411 = vmatpush.msra.mxu2 %v384_v42  ;;  %595 = vmatpush.msrb.mxu3 %v384_v42 }
  0xae   :  { %v191_v48 = vrot.slane %v190_v47, 2  ;;  %v234_v49 = vsel %vm233_vm1, %v188_v46, %v182_v45 }
  0xaf   :  { %v153_v50 = vpop.f32.mrf.mxu0 }
  0xb0   :  { %v192_v51 = vmax.f32 %v190_v47, %v191_v48  ;;  %v171_v52 = vmax.f32 %v153_v50, 0.0  ;;  %v382_v50 = vld [vmem:[#allocation10] sm:$0xff] }
  0xb2   :  { %v193_v53 = vrot.slane %v192_v51, 1  ;;  %v195_v54 = vrot.slane %v171_v52, 4  ;;  %291 = vmatmul.f32.gmra.mxu1 %v171_v52 }
  0xb4   :  { %v194_v55 = vmax.f32 %v192_v51, %v193_v53  ;;  %v196_v56 = vmax.f32 %v171_v52, %v195_v54 }
  0xb6   :  { %v197_v57 = vrot.slane %v196_v56, 2  ;;  %v236_v58 = vsel %vm235_vm2, %v194_v55, %v234_v49  ;;  %v383_v49 = vld [vmem:[#allocation10 + $0x8] sm:$0xff] }
  0xb7   :  { %v156_v59 = vpop.f32.mrf.mxu0  ;;  %412 = vmatpush.msra.mxu2 %v383_v49  ;;  %596 = vmatpush.msrb.mxu3 %v383_v49 }
  0xb8   :  { %v198_v60 = vmax.f32 %v196_v56, %v197_v57  ;;  %v172_v61 = vmax.f32 %v156_v59, 0.0 }
  0xb9   :  { %413 = vmatpush.msra.mxu2 %v382_v50  ;;  %597 = vmatpush.msrb.mxu3 %v382_v50 }
  0xba   :  { %v199_v62 = vrot.slane %v198_v60, 1  ;;  %v201_v63 = vrot.slane %v172_v61, 4  ;;  %294 = vmatmul.f32.gmra.mxu1 %v172_v61 }
  0xbc   :  { %v200_v0 = vmax.f32 %v198_v60, %v199_v62  ;;  %v202_v1 = vmax.f32 %v172_v61, %v201_v63 }
  0xbe   :  { %v203_v4 = vrot.slane %v202_v1, 2  ;;  %v238_v6 = vsel %vm237_vm3, %v200_v0, %v236_v58 }
  0xbf   :  { %v159_v7 = vpop.f32.mrf.mxu0 }
  0xc0   :  { %v204_v8 = vmax.f32 %v202_v1, %v203_v4  ;;  %v173_v9 = vmax.f32 %v159_v7, 0.0 }
  0xc2   :  { %v205_v11 = vrot.slane %v204_v8, 1  ;;  %v207_v12 = vrot.slane %v173_v9, 4  ;;  %297 = vmatmul.f32.gmra.mxu1 %v173_v9 }
  0xc4   :  { %v206_v14 = vmax.f32 %v204_v8, %v205_v11  ;;  %v208_v15 = vmax.f32 %v173_v9, %v207_v12 }
  0xc6   :  { %v209_v17 = vrot.slane %v208_v15, 2  ;;  %v240_v19 = vsel %vm239_vm4, %v206_v14, %v238_v6 }
  0xc7   :  { %v162_v20 = vpop.f32.mrf.mxu0 }
  0xc8   :  { %v210_v21 = vmax.f32 %v208_v15, %v209_v17  ;;  %v174_v22 = vmax.f32 %v162_v20, 0.0 }
  0xca   :  { %v211_v24 = vrot.slane %v210_v21, 1  ;;  %v213_v25 = vrot.slane %v174_v22, 4  ;;  %300 = vmatmul.f32.vlgmr.msra.gmra.mxu3 %v174_v22 }
  0xcc   :  { %v212_v27 = vmax.f32 %v210_v21, %v211_v24  ;;  %v214_v28 = vmax.f32 %v174_v22, %v213_v25 }
  0xce   :  { %v215_v30 = vrot.slane %v214_v28, 2  ;;  %v242_v32 = vsel %vm241_vm5, %v212_v27, %v240_v19 }
  0xcf   :  { %v165_v33 = vpop.f32.mrf.mxu0 }
  0xd0   :  { %v216_v34 = vmax.f32 %v214_v28, %v215_v30  ;;  %v175_v35 = vmax.f32 %v165_v33, 0.0 }
  0xd2   :  { %v217_v37 = vrot.slane %v216_v34, 1  ;;  %v219_v38 = vrot.slane %v175_v35, 4  ;;  %303 = vmatmul.f32.gmra.mxu3 %v175_v35 }
  0xd4   :  { %v218_v40 = vmax.f32 %v216_v34, %v217_v37  ;;  %v220_v41 = vmax.f32 %v175_v35, %v219_v38 }
  0xd6   :  { %v221_v43 = vrot.slane %v220_v41, 2  ;;  %v244_v44 = vsel %vm243_vm6, %v218_v40, %v242_v32 }
  0xd8   :  { %v222_v45 = vmax.f32 %v220_v41, %v221_v43 }
  0xda   :  { %v223_v46 = vrot.slane %v222_v45, 1 }
  0xdc   :  { %v224_v47 = vmax.f32 %v222_v45, %v223_v46 }
  0xde   :  { %v774_v48 = vsel %vm245_vm7, %v224_v47, %v244_v44 }
 0x117   :  { %v283_v51 = vpop.f32.mrf.mxu1 }
 0x118   :  { %v307_v52 = vmax.f32 %v283_v51, 0.0 }
 0x11a   :  { %v316_v53 = vrot.slane %v307_v52, 4  ;;  %414 = vmatmul.f32.vlgmr.msra.gmra.mxu2 %v307_v52 }
 0x11c   :  { %v317_v54 = vmax.f32 %v307_v52, %v316_v53 }
 0x11e   :  { %v318_v56 = vrot.slane %v317_v54, 2 }
 0x11f   :  { %v286_v55 = vpop.f32.mrf.mxu1 }
 0x120   :  { %v308_v57 = vmax.f32 %v286_v55, 0.0  ;;  %v319_v59 = vmax.f32 %v317_v54, %v318_v56 }
 0x122   :  { %v322_v58 = vrot.slane %v308_v57, 4  ;;  %417 = vmatmul.f32.gmra.mxu2 %v308_v57  ;;  %v320_v63 = vrot.slane %v319_v59, 1 }
 0x124   :  { %v323_v60 = vmax.f32 %v308_v57, %v322_v58  ;;  %v321_v4 = vmax.f32 %v319_v59, %v320_v63  ;;  %v248_v59 = vmax.f32 %v774_v48, 0.0 }
 0x126   :  { %v324_v61 = vrot.slane %v323_v60, 2 }
 0x127   :  { %v289_v62 = vpop.f32.mrf.mxu1 }
 0x128   :  { %v325_v0 = vmax.f32 %v323_v60, %v324_v61  ;;  %v309_v1 = vmax.f32 %v289_v62, 0.0 }
 0x12a   :  { %v326_v2 = vrot.slane %v325_v0, 1  ;;  %v328_v3 = vrot.slane %v309_v1, 4  ;;  %420 = vmatmul.f32.gmra.mxu2 %v309_v1 }
 0x12c   :  { %v327_v5 = vmax.f32 %v325_v0, %v326_v2  ;;  %v329_v6 = vmax.f32 %v309_v1, %v328_v3 }
 0x12e   :  { %v330_v7 = vrot.slane %v329_v6, 2  ;;  %v372_v8 = vsel %vm233_vm1, %v327_v5, %v321_v4 }
 0x12f   :  { %v292_v9 = vpop.f32.mrf.mxu1 }
 0x130   :  { %v331_v10 = vmax.f32 %v329_v6, %v330_v7  ;;  %v310_v11 = vmax.f32 %v292_v9, 0.0 }
 0x132   :  { %v332_v12 = vrot.slane %v331_v10, 1  ;;  %v334_v13 = vrot.slane %v310_v11, 4  ;;  %423 = vmatmul.f32.gmra.mxu2 %v310_v11 }
 0x134   :  { %v333_v14 = vmax.f32 %v331_v10, %v332_v12  ;;  %v335_v15 = vmax.f32 %v310_v11, %v334_v13 }
 0x136   :  { %v336_v16 = vrot.slane %v335_v15, 2  ;;  %v373_v17 = vsel %vm235_vm2, %v333_v14, %v372_v8 }
 0x137   :  { %v295_v18 = vpop.f32.mrf.mxu1 }
 0x138   :  { %v337_v19 = vmax.f32 %v335_v15, %v336_v16  ;;  %v311_v20 = vmax.f32 %v295_v18, 0.0 }
 0x13a   :  { %v338_v21 = vrot.slane %v337_v19, 1  ;;  %v340_v22 = vrot.slane %v311_v20, 4  ;;  %426 = vmatmul.f32.gmra.mxu2 %v311_v20 }
 0x13c   :  { %v339_v23 = vmax.f32 %v337_v19, %v338_v21  ;;  %v341_v24 = vmax.f32 %v311_v20, %v340_v22 }
 0x13e   :  { %v342_v25 = vrot.slane %v341_v24, 2  ;;  %v374_v26 = vsel %vm237_vm3, %v339_v23, %v373_v17 }
 0x13f   :  { %v298_v27 = vpop.f32.mrf.mxu1 }
 0x140   :  { %v343_v28 = vmax.f32 %v341_v24, %v342_v25  ;;  %v312_v29 = vmax.f32 %v298_v27, 0.0 }
 0x142   :  { %v344_v30 = vrot.slane %v343_v28, 1  ;;  %v346_v31 = vrot.slane %v312_v29, 4  ;;  %429 = vmatmul.f32.gmra.mxu2 %v312_v29 }
 0x144   :  { %v345_v32 = vmax.f32 %v343_v28, %v344_v30  ;;  %v347_v33 = vmax.f32 %v312_v29, %v346_v31 }
 0x146   :  { %v348_v34 = vrot.slane %v347_v33, 2  ;;  %v375_v35 = vsel %vm239_vm4, %v345_v32, %v374_v26 }
 0x148   :  { %v349_v36 = vmax.f32 %v347_v33, %v348_v34 }
 0x14a   :  { %v350_v37 = vrot.slane %v349_v36, 1 }
 0x14c   :  { %v351_v38 = vmax.f32 %v349_v36, %v350_v37 }
 0x14d   :  { %v301_v39 = vpop.f32.mrf.mxu3 }
 0x14e   :  { %v313_v40 = vmax.f32 %v301_v39, 0.0  ;;  %v376_v41 = vsel %vm241_vm5, %v351_v38, %v375_v35 }
 0x150   :  { %v352_v42 = vrot.slane %v313_v40, 4  ;;  %432 = vmatmul.f32.vlgmr.msrb.gmra.mxu3 %v313_v40 }
 0x152   :  { %v353_v43 = vmax.f32 %v313_v40, %v352_v42 }
 0x154   :  { %v354_v44 = vrot.slane %v353_v43, 2 }
 0x155   :  { %v304_v45 = vpop.f32.mrf.mxu3 }
 0x156   :  { %v355_v46 = vmax.f32 %v353_v43, %v354_v44  ;;  %v314_v47 = vmax.f32 %v304_v45, 0.0 }
 0x158   :  { %v356_v49 = vrot.slane %v355_v46, 1  ;;  %v358_v50 = vrot.slane %v314_v47, 4  ;;  %435 = vmatmul.f32.gmra.mxu3 %v314_v47 }
 0x15a   :  { %v357_v51 = vmax.f32 %v355_v46, %v356_v49  ;;  %v359_v52 = vmax.f32 %v314_v47, %v358_v50 }
 0x15c   :  { %v360_v53 = vrot.slane %v359_v52, 2  ;;  %v377_v54 = vsel %vm243_vm6, %v357_v51, %v376_v41 }
 0x15e   :  { %v361_v55 = vmax.f32 %v359_v52, %v360_v53 }
 0x160   :  { %v362_v56 = vrot.slane %v361_v55, 1 }
 0x162   :  { %v363_v57 = vmax.f32 %v361_v55, %v362_v56 }
 0x164   :  { %v378_v58 = vsel %vm245_vm7, %v363_v57, %v377_v54 }
 0x165   :  { %v380_v60 = vmax.f32 %v378_v58, 0.0 }
 0x167   :  { %v784_v61 = vadd.f32 %v380_v60, %v248_v59 }
 0x19d   :  { %v415_v62 = vpop.f32.mrf.mxu2 }
 0x19e   :  { %v439_v6 = vmax.f32 %v415_v62, 0.0 }
 0x1a0   :  { %v448_v12 = vrot.slane %v439_v6, 4 }
 0x1a2   :  { %v449_v17 = vmax.f32 %v439_v6, %v448_v12 }
 0x1a4   :  { %v450_v25 = vrot.slane %v449_v17, 2 }
 0x1a5   :  { %v418_v63 = vpop.f32.mrf.mxu2 }
 0x1a6   :  { %v440_v3 = vmax.f32 %v418_v63, 0.0  ;;  %v451_v33 = vmax.f32 %v449_v17, %v450_v25 }
 0x1a8   :  { %v454_v9 = vrot.slane %v440_v3, 4  ;;  %v452_v43 = vrot.slane %v451_v33, 1 }
 0x1aa   :  { %v455_v14 = vmax.f32 %v440_v3, %v454_v9  ;;  %v453_v53 = vmax.f32 %v451_v33, %v452_v43 }
 0x1ac   :  { %v456_v21 = vrot.slane %v455_v14, 2 }
 0x1ad   :  { %v421_v0 = vpop.f32.mrf.mxu2 }
 0x1ae   :  { %v441_v4 = vmax.f32 %v421_v0, 0.0  ;;  %v457_v29 = vmax.f32 %v455_v14, %v456_v21 }
 0x1b0   :  { %v460_v11 = vrot.slane %v441_v4, 4  ;;  %v458_v38 = vrot.slane %v457_v29, 1 }
 0x1b2   :  { %v461_v16 = vmax.f32 %v441_v4, %v460_v11  ;;  %v459_v47 = vmax.f32 %v457_v29, %v458_v38 }
 0x1b4   :  { %v462_v24 = vrot.slane %v461_v16, 2  ;;  %v504_v57 = vsel %vm233_vm1, %v459_v47, %v453_v53 }
 0x1b5   :  { %v424_v1 = vpop.f32.mrf.mxu2 }
 0x1b6   :  { %v442_v7 = vmax.f32 %v424_v1, 0.0  ;;  %v463_v32 = vmax.f32 %v461_v16, %v462_v24 }
 0x1b8   :  { %v466_v13 = vrot.slane %v442_v7, 4  ;;  %v464_v41 = vrot.slane %v463_v32, 1 }
 0x1ba   :  { %v467_v18 = vmax.f32 %v442_v7, %v466_v13  ;;  %v465_v51 = vmax.f32 %v463_v32, %v464_v41  ;;  %v604_v7 = vld [vmem:[%s804_s4] ss:$0 sm:$0xff] }
 0x1bc   :  { %v468_v26 = vrot.slane %v467_v18, 2  ;;  %v505_v60 = vsel %vm235_vm2, %v465_v51, %v504_v57 }
 0x1bd   :  { %v427_v2 = vpop.f32.mrf.mxu2 }
 0x1be   :  { %v443_v8 = vmax.f32 %v427_v2, 0.0  ;;  %v469_v34 = vmax.f32 %v467_v18, %v468_v26 }
 0x1c0   :  { %v472_v48 = vrot.slane %v443_v8, 4  ;;  %v470_v44 = vrot.slane %v469_v34, 1 }
 0x1c2   :  { %v473_v19 = vmax.f32 %v443_v8, %v472_v48  ;;  %v471_v54 = vmax.f32 %v469_v34, %v470_v44 }
 0x1c4   :  { %v474_v28 = vrot.slane %v473_v19, 2  ;;  %v506_v63 = vsel %vm237_vm3, %v471_v54, %v505_v60 }
 0x1c5   :  { %v430_v5 = vpop.f32.mrf.mxu2 }
 0x1c6   :  { %v444_v10 = vmax.f32 %v430_v5, 0.0  ;;  %v475_v36 = vmax.f32 %v473_v19, %v474_v28 }
 0x1c8   :  { %v478_v15 = vrot.slane %v444_v10, 4  ;;  %v476_v46 = vrot.slane %v475_v36, 1 }
 0x1ca   :  { %v479_v22 = vmax.f32 %v444_v10, %v478_v15  ;;  %v477_v56 = vmax.f32 %v475_v36, %v476_v46 }
 0x1cc   :  { %v480_v30 = vrot.slane %v479_v22, 2  ;;  %v507_v1 = vsel %vm239_vm4, %v477_v56, %v506_v63 }
 0x1ce   :  { %v481_v39 = vmax.f32 %v479_v22, %v480_v30 }
 0x1d0   :  { %v482_v49 = vrot.slane %v481_v39, 1 }
 0x1d2   :  { %v483_v58 = vmax.f32 %v481_v39, %v482_v49 }
 0x1d3   :  { %v433_v20 = vpop.f32.mrf.mxu3 }
 0x1d4   :  { %v445_v23 = vmax.f32 %v433_v20, 0.0  ;;  %v508_v3 = vsel %vm241_vm5, %v483_v58, %v507_v1 }
 0x1d6   :  { %v484_v27 = vrot.slane %v445_v23, 4 }
 0x1d8   :  { %v485_v31 = vmax.f32 %v445_v23, %v484_v27 }
 0x1da   :  { %v486_v35 = vrot.slane %v485_v31, 2 }
 0x1db   :  { %v436_v37 = vpop.f32.mrf.mxu3 }
 0x1dc   :  { %v446_v40 = vmax.f32 %v436_v37, 0.0  ;;  %v487_v42 = vmax.f32 %v485_v31, %v486_v35 }
 0x1de   :  { %v490_v45 = vrot.slane %v446_v40, 4  ;;  %v488_v52 = vrot.slane %v487_v42, 1 }
 0x1e0   :  { %v491_v50 = vmax.f32 %v446_v40, %v490_v45  ;;  %v489_v62 = vmax.f32 %v487_v42, %v488_v52 }
 0x1e2   :  { %v492_v55 = vrot.slane %v491_v50, 2  ;;  %v509_v4 = vsel %vm243_vm6, %v489_v62, %v508_v3 }
 0x1e4   :  { %v493_v59 = vmax.f32 %v491_v50, %v492_v55 }
 0x1e6   :  { %v494_v0 = vrot.slane %v493_v59, 1 }
 0x1e8   :  { %v495_v2 = vmax.f32 %v493_v59, %v494_v0 }
 0x1ea   :  { %v510_v5 = vsel %vm245_vm7, %v495_v2, %v509_v4 }
 0x1eb   :  { %v512_v6 = vmax.f32 %v510_v5, 0.0 }
 0x1ed   :  { %v521_v8 = vadd.f32 %v784_v61, %v512_v6 }
 0x1ef   :  { %v526_v9 = vmul.f32 %v604_v7, %v521_v8 }
 0x1f1   :  { %527 = vadd.xlane.f32.xlu0 %v526_v9 }
 0x264   :  { %v528_v10 = vpop.xlane.xlu0 %527 }
 0x265   :  { %v565_v11 = vmul.f32 -1.442695, %v528_v10 }
 0x267   :  { %605 = vpow2.f32 %v565_v11 }
 0x26d   :  { %v606_v12 = vpop.eup %605 }
 0x26e   :  { %v532_v13 = vadd.f32 1.0, %v606_v12 }
 0x270   :  { %607 = vrcp.f32 %v532_v13  ;;  %v544_v16 = vand.u32 2147483648, %v532_v13  ;;  %v542_v18 = vand.u32 2147483647, %v532_v13  ;;  %vm538_vm9 = vweird.f32 %v532_v13 }
 0x272   :  { %v545_v20 = vor.u32 1.1754944e-38, %v544_v16  ;;  %vm543_vm12 = vcmp.eq.f32.partialorder %v542_v18, 8.507059e+37 }
 0x276   :  { %v608_v48 = vpop.eup %607 }
 0x277   :  { %v534_v14 = vmul.f32 %v608_v48, %v532_v13  ;;  %vm539_vm8 = vweird.f32 %v608_v48 }
 0x278   :  { %vm540_vm10 = vmor %vm538_vm9, %vm539_vm8 }
 0x279   :  { %v535_v15 = vsub.f32 1.0, %v534_v14 }
 0x27b   :  { %v536_v17 = vmul.f32 %v608_v48, %v535_v15 }
 0x27d   :  { %v537_v19 = vadd.f32 %v608_v48, %v536_v17 }
 0x27f   :  { %v541_v61 = vsel %vm540_vm10, %v608_v48, %v537_v19 }
 0x280   :  { %v546_v21 = vsel %vm543_vm12, %v545_v20, %v541_v61 }
 0x281   :  { %549 = vst.msk [vmem:[%s805_s5] sm:$0xff] %vm548_vm11, %v546_v21 }
 0x282   :  { %554 = vsyncpa [#allocation6], 1 }
 0x283   :  { %555 = vsyncpa [#allocation8], 1 }
 0x284   :  { %556 = vsyncpa [#allocation11], 1 }

// kernel: tpu_custom_call.1
= control target key start
LH: loop header
LB: loop body
LE: loop exit
PB: predicated region body
PF: predicated region fallthrough
CT: control target
= control target key end

     0   :  { %10 = vsyncpa [#allocation6], 0  ;;  %s800_s0 = inlined_call_operand.hbm [shape: f32[8,8,32], index: 0, kind: input, shape index: {}]   ;;  %s801_s1 = inlined_call_operand.hbm [shape: f32[32,128], index: 1, kind: input, shape index: {}]   ;;  %s802_s2 = inlined_call_operand.hbm [shape: f32[128,128], index: 2, kind: input, shape index: {}]   ;;  %s803_s3 = inlined_call_operand.hbm [shape: f32[128,128], index: 3, kind: input, shape index: {}]   ;;  %s804_s4 = inlined_call_operand.vmem [shape: f32[1,128], index: 4, kind: input, shape index: {}]   ;;  %s805_s5 = inlined_call_operand.vmem [shape: f32[8,1], index: 5, kind: output, shape index: {}]  }
   0x1   :  { %11 = vsyncpa [#allocation8], 0 }
   0x2   :  { %12 = vsyncpa [#allocation11], 0  ;;  %s30_s20 = sshll.u32 %s801_s1, 4  ;;  %s711_s21 = smov [#allocation7]   ;;  %s31_s20 = int_to_ptr.hbm [resolvable:$true] %s30_s20 }
   0x3   :  { %s32_s22 = sshll.u32 %s711_s21, 4  ;;  %s17_s25 = sshll.u32 %s800_s0, 4  ;;  %s33_s22 = int_to_ptr.vmem [resolvable:$true] %s32_s22  ;;  %s18_s25 = int_to_ptr.hbm [resolvable:$true] %s17_s25 }
   0x4   :  { %s712_s26 = smov 128   ;;  %s713_s27 = smov 8  }
   0x5   :  { %38 = dma.hbm_to_vmem [thread:$0]  %s31_s20, 512, %s33_s22, [#allocation8], %s712_s26, %s712_s26, %s713_s27  }
   0x6   :  { %s714_s28 = smov [#allocation5]   ;;  %s43_s7 = sshll.u32 %s802_s2, 4  ;;  %s44_s7 = int_to_ptr.hbm [resolvable:$true] %s43_s7 }
   0x7   :  { %s19_s29 = sshll.u32 %s714_s28, 4  ;;  %s56_s9 = sshll.u32 %s803_s3, 4  ;;  %s20_s29 = int_to_ptr.vmem [resolvable:$true] %s19_s29  ;;  %s57_s9 = int_to_ptr.hbm [resolvable:$true] %s56_s9 }
   0x8   :  { %25 = dma.hbm_to_vmem [thread:$0]  %s18_s25, 1024, %s20_s29, [#allocation6], %s712_s26, %s712_s26, %s713_s27  }
   0x9   :  { %s715_s10 = smov [#allocation9]   ;;  %s716_s0 = smov [#allocation10]  }
   0xa   :  { %s45_s11 = sshll.u32 %s715_s10, 4  ;;  %s58_s12 = sshll.u32 %s716_s0, 4  ;;  %s46_s11 = int_to_ptr.vmem [resolvable:$true] %s45_s11  ;;  %s59_s12 = int_to_ptr.vmem [resolvable:$true] %s58_s12 }
   0xb   :  { %51 = dma.hbm_to_vmem [thread:$0]  %s44_s7, 2048, %s46_s11, [#allocation8], %s712_s26, %s712_s26, %s713_s27  }
   0xc   :  { %64 = dma.hbm_to_vmem [thread:$0]  %s57_s9, 2048, %s59_s12, [#allocation11], %s712_s26, %s712_s26, %s713_s27  }
   0xd   :  { %705 = dma.done.wait [#allocation6], 1024  }
   0xe   :  { %706 = vsyncadd [#allocation6], 4294966272 }
   0xf   :  { %707 = dma.done.wait [#allocation8], 2560  }
  0x10   :  { %708 = vsyncadd [#allocation8], 4294964736 }
  0x11   :  { %709 = dma.done.wait [#allocation11], 2048  }
  0x12   :  { %710 = vsyncadd [#allocation11], 4294965248  ;;  %v101_v0 = vld [vmem:[#allocation7 + $0x18] sm:$0xff]  ;;  %v100_v1 = vld [vmem:[#allocation7 + $0x10] sm:$0xff]  ;;  %vm102_vm0 = vcmask 261120   ;;  %vm233_vm1 = vcmask 1041409  }
  0x13   :  { %139 = vmatpush.msra.mxu0 %v101_v0  ;;  %v99_v2 = vld [vmem:[#allocation7 + $0x8] sm:$0xff]  ;;  %v98_v3 = vld [vmem:[#allocation7] sm:$0xff]  ;;  %v92_v6 = vld [vmem:[#allocation5 + $0x10] sm:$0xff]  ;;  %vm235_vm2 = vcmask 1042434   ;;  %vm237_vm3 = vcmask 1043459   ;;  %vm239_vm4 = vcmask 1044484  }
  0x14   :  { %v90_v4 = vld [vmem:[#allocation5] sm:$0xff]  ;;  %v91_v5 = vld [vmem:[#allocation5 + $0x8] sm:$0xff]  ;;  %v93_v7 = vld [vmem:[#allocation5 + $0x18] sm:$0xff]  ;;  %vm241_vm5 = vcmask 1045509   ;;  %vm243_vm6 = vcmask 1046534   ;;  %vm245_vm7 = vcmask 1047559  }
  0x15   :  { %140 = vmatpush.msra.mxu0 %v100_v1  ;;  %v265_v8 = vld [vmem:[#allocation9 + $0x78] sm:$0xff]  ;;  %v264_v9 = vld [vmem:[#allocation9 + $0x70] sm:$0xff]  ;;  %v263_v10 = vld [vmem:[#allocation9 + $0x68] sm:$0xff]  ;;  %vm548_vm11 = vcmask 7168  }
  0x16   :  { %266 = vmatpush.msra.mxu1 %v265_v8  ;;  %566 = vmatpush.msra.mxu3 %v265_v8  ;;  %v262_v11 = vld [vmem:[#allocation9 + $0x60] sm:$0xff]  ;;  %v261_v13 = vld [vmem:[#allocation9 + $0x58] sm:$0xff]  ;;  %v260_v14 = vld [vmem:[#allocation9 + $0x50] sm:$0xff] }
  0x17   :  { %141 = vmatpush.msra.mxu0 %v99_v2  ;;  %v94_v12 = vld [vmem:[#allocation5 + $0x20] sm:$0xff]  ;;  %v259_v15 = vld [vmem:[#allocation9 + $0x48] sm:$0xff]  ;;  %v257_v18 = vld [vmem:[#allocation9 + $0x38] sm:$0xff] }
  0x18   :  { %267 = vmatpush.msra.mxu1 %v264_v9  ;;  %567 = vmatpush.msra.mxu3 %v264_v9  ;;  %v258_v16 = vld [vmem:[#allocation9 + $0x40] sm:$0xff]  ;;  %v95_v17 = vld [vmem:[#allocation5 + $0x28] sm:$0xff]  ;;  %v256_v19 = vld [vmem:[#allocation9 + $0x30] sm:$0xff] }
  0x19   :  { %142 = vmatpush.msra.mxu0 %v98_v3  ;;  %v255_v20 = vld [vmem:[#allocation9 + $0x28] sm:$0xff]  ;;  %v254_v21 = vld [vmem:[#allocation9 + $0x20] sm:$0xff]  ;;  %v96_v22 = vld [vmem:[#allocation5 + $0x30] sm:$0xff] }
  0x1a   :  { %557 = vmatmul.msk.f32.vlgmr.msra.gmra.mxu0 %vm102_vm0, %v90_v4  ;;  %268 = vmatpush.msra.mxu1 %v263_v10  ;;  %v253_v23 = vld [vmem:[#allocation9 + $0x18] sm:$0xff]  ;;  %v252_v24 = vld [vmem:[#allocation9 + $0x10] sm:$0xff]  ;;  %v251_v26 = vld [vmem:[#allocation9 + $0x8] sm:$0xff] }
  0x1b   :  { %568 = vmatpush.msra.mxu3 %v263_v10  ;;  %v97_v25 = vld [vmem:[#allocation5 + $0x38] sm:$0xff]  ;;  %v250_v27 = vld [vmem:[#allocation9] sm:$0xff]  ;;  %v396_v3 = vld [vmem:[#allocation10 + $0x70] sm:$0xff] }
  0x1c   :  { %269 = vmatpush.msra.mxu1 %v262_v11  ;;  %v397_v2 = vld [vmem:[#allocation10 + $0x78] sm:$0xff]  ;;  %v394_v10 = vld [vmem:[#allocation10 + $0x60] sm:$0xff] }
  0x1d   :  { %569 = vmatpush.msra.mxu3 %v262_v11  ;;  %398 = vmatpush.msra.mxu2 %v397_v2 }
  0x1e   :  { %270 = vmatpush.msra.mxu1 %v261_v13 }
  0x1f   :  { %570 = vmatpush.msra.mxu3 %v261_v13  ;;  %399 = vmatpush.msra.mxu2 %v396_v3  ;;  %v393_v13 = vld [vmem:[#allocation10 + $0x58] sm:$0xff] }
  0x20   :  { %271 = vmatpush.msra.mxu1 %v260_v14 }
  0x21   :  { %571 = vmatpush.msra.mxu3 %v260_v14 }
  0x22   :  { %558 = vmatmul.msk.f32.gmra.mxu0 %vm102_vm0, %v91_v5  ;;  %272 = vmatpush.msra.mxu1 %v259_v15  ;;  %v395_v5 = vld [vmem:[#allocation10 + $0x68] sm:$0xff] }
  0x23   :  { %572 = vmatpush.msra.mxu3 %v259_v15  ;;  %400 = vmatpush.msra.mxu2 %v395_v5 }
  0x24   :  { %273 = vmatpush.msra.mxu1 %v258_v16 }
  0x25   :  { %573 = vmatpush.msra.mxu3 %v258_v16  ;;  %401 = vmatpush.msra.mxu2 %v394_v10  ;;  %v392_v16 = vld [vmem:[#allocation10 + $0x50] sm:$0xff] }
  0x26   :  { %274 = vmatpush.msra.mxu1 %v257_v18 }
  0x27   :  { %574 = vmatpush.msra.mxu3 %v257_v18  ;;  %402 = vmatpush.msra.mxu2 %v393_v13  ;;  %v391_v18 = vld [vmem:[#allocation10 + $0x48] sm:$0xff] }
  0x28   :  { %275 = vmatpush.msra.mxu1 %v256_v19 }
  0x29   :  { %575 = vmatpush.msra.mxu3 %v256_v19  ;;  %403 = vmatpush.msra.mxu2 %v392_v16 }
  0x2a   :  { %559 = vmatmul.msk.f32.gmra.mxu0 %vm102_vm0, %v92_v6  ;;  %276 = vmatpush.msra.mxu1 %v255_v20 }
  0x2b   :  { %576 = vmatpush.msra.mxu3 %v255_v20  ;;  %404 = vmatpush.msra.mxu2 %v391_v18 }
  0x2c   :  { %277 = vmatpush.msra.mxu1 %v254_v21 }
  0x2d   :  { %577 = vmatpush.msra.mxu3 %v254_v21 }
  0x2e   :  { %278 = vmatpush.msra.mxu1 %v253_v23 }
  0x2f   :  { %578 = vmatpush.msra.mxu3 %v253_v23  ;;  %v390_v23 = vld [vmem:[#allocation10 + $0x40] sm:$0xff] }
  0x30   :  { %279 = vmatpush.msra.mxu1 %v252_v24  ;;  %405 = vmatpush.msra.mxu2 %v390_v23 }
  0x31   :  { %579 = vmatpush.msra.mxu3 %v252_v24 }
  0x32   :  { %560 = vmatmul.msk.f32.gmra.mxu0 %vm102_vm0, %v93_v7  ;;  %280 = vmatpush.msra.mxu1 %v251_v26 }
  0x33   :  { %580 = vmatpush.msra.mxu3 %v251_v26  ;;  %v389_v26 = vld [vmem:[#allocation10 + $0x38] sm:$0xff] }
  0x34   :  { %281 = vmatpush.msra.mxu1 %v250_v27  ;;  %406 = vmatpush.msra.mxu2 %v389_v26 }
  0x35   :  { %581 = vmatpush.msra.mxu3 %v250_v27 }
  0x37   :  { %582 = vmatpush.msrb.mxu3 %v397_v2 }
  0x39   :  { %583 = vmatpush.msrb.mxu3 %v396_v3 }
  0x3a   :  { %561 = vmatmul.msk.f32.gmra.mxu0 %vm102_vm0, %v94_v12 }
  0x3b   :  { %584 = vmatpush.msrb.mxu3 %v395_v5 }
  0x3d   :  { %585 = vmatpush.msrb.mxu3 %v394_v10 }
  0x3f   :  { %586 = vmatpush.msrb.mxu3 %v393_v13 }
  0x41   :  { %587 = vmatpush.msrb.mxu3 %v392_v16 }
  0x42   :  { %562 = vmatmul.msk.f32.gmra.mxu0 %vm102_vm0, %v95_v17 }
  0x43   :  { %588 = vmatpush.msrb.mxu3 %v391_v18 }
  0x45   :  { %589 = vmatpush.msrb.mxu3 %v390_v23 }
  0x47   :  { %590 = vmatpush.msrb.mxu3 %v389_v26 }
  0x4a   :  { %563 = vmatmul.msk.f32.gmra.mxu0 %vm102_vm0, %v96_v22 }
  0x52   :  { %564 = vmatmul.msk.f32.gmra.mxu0 %vm102_vm0, %v97_v25 }
  0x97   :  { %v144_v28 = vpop.f32.mrf.mxu0 }
  0x98   :  { %v168_v29 = vmax.f32 %v144_v28, 0.0 }
  0x9a   :  { %v177_v30 = vrot.slane %v168_v29, 4  ;;  %282 = vmatmul.f32.vlgmr.msra.gmra.mxu1 %v168_v29 }
  0x9c   :  { %v178_v31 = vmax.f32 %v168_v29, %v177_v30  ;;  %v388_v29 = vld [vmem:[#allocation10 + $0x30] sm:$0xff] }
  0x9d   :  { %407 = vmatpush.msra.mxu2 %v388_v29  ;;  %591 = vmatpush.msrb.mxu3 %v388_v29 }
  0x9e   :  { %v179_v33 = vrot.slane %v178_v31, 2 }
  0x9f   :  { %v147_v32 = vpop.f32.mrf.mxu0 }
  0xa0   :  { %v169_v34 = vmax.f32 %v147_v32, 0.0  ;;  %v180_v36 = vmax.f32 %v178_v31, %v179_v33  ;;  %v387_v31 = vld [vmem:[#allocation10 + $0x28] sm:$0xff] }
  0xa1   :  { %408 = vmatpush.msra.mxu2 %v387_v31  ;;  %592 = vmatpush.msrb.mxu3 %v387_v31 }
  0xa2   :  { %v183_v35 = vrot.slane %v169_v34, 4  ;;  %285 = vmatmul.f32.gmra.mxu1 %v169_v34  ;;  %v181_v40 = vrot.slane %v180_v36, 1 }
  0xa4   :  { %v184_v37 = vmax.f32 %v169_v34, %v183_v35  ;;  %v182_v45 = vmax.f32 %v180_v36, %v181_v40  ;;  %v386_v36 = vld [vmem:[#allocation10 + $0x20] sm:$0xff] }
  0xa5   :  { %409 = vmatpush.msra.mxu2 %v386_v36  ;;  %593 = vmatpush.msrb.mxu3 %v386_v36 }
  0xa6   :  { %v185_v38 = vrot.slane %v184_v37, 2 }
  0xa7   :  { %v150_v39 = vpop.f32.mrf.mxu0 }
  0xa8   :  { %v186_v41 = vmax.f32 %v184_v37, %v185_v38  ;;  %v170_v42 = vmax.f32 %v150_v39, 0.0  ;;  %v385_v39 = vld [vmem:[#allocation10 + $0x18] sm:$0xff] }
  0xa9   :  { %410 = vmatpush.msra.mxu2 %v385_v39  ;;  %594 = vmatpush.msrb.mxu3 %v385_v39 }
  0xaa   :  { %v187_v43 = vrot.slane %v186_v41, 1  ;;  %v189_v44 = vrot.slane %v170_v42, 4  ;;  %288 = vmatmul.f32.gmra.mxu1 %v170_v42 }
  0xac   :  { %v188_v46 = vmax.f32 %v186_v41, %v187_v43  ;;  %v190_v47 = vmax.f32 %v170_v42, %v189_v44  ;;  %v384_v42 = vld [vmem:[#allocation10 + $0x10] sm:$0xff] }
  0xad   :  { %411 = vmatpush.msra.mxu2 %v384_v42  ;;  %595 = vmatpush.msrb.mxu3 %v384_v42 }
  0xae   :  { %v191_v48 = vrot.slane %v190_v47, 2  ;;  %v234_v49 = vsel %vm233_vm1, %v188_v46, %v182_v45 }
  0xaf   :  { %v153_v50 = vpop.f32.mrf.mxu0 }
  0xb0   :  { %v192_v51 = vmax.f32 %v190_v47, %v191_v48  ;;  %v171_v52 = vmax.f32 %v153_v50, 0.0  ;;  %v382_v50 = vld [vmem:[#allocation10] sm:$0xff] }
  0xb2   :  { %v193_v53 = vrot.slane %v192_v51, 1  ;;  %v195_v54 = vrot.slane %v171_v52, 4  ;;  %291 = vmatmul.f32.gmra.mxu1 %v171_v52 }
  0xb4   :  { %v194_v55 = vmax.f32 %v192_v51, %v193_v53  ;;  %v196_v56 = vmax.f32 %v171_v52, %v195_v54 }
  0xb6   :  { %v197_v57 = vrot.slane %v196_v56, 2  ;;  %v236_v58 = vsel %vm235_vm2, %v194_v55, %v234_v49  ;;  %v383_v49 = vld [vmem:[#allocation10 + $0x8] sm:$0xff] }
  0xb7   :  { %v156_v59 = vpop.f32.mrf.mxu0  ;;  %412 = vmatpush.msra.mxu2 %v383_v49  ;;  %596 = vmatpush.msrb.mxu3 %v383_v49 }
  0xb8   :  { %v198_v60 = vmax.f32 %v196_v56, %v197_v57  ;;  %v172_v61 = vmax.f32 %v156_v59, 0.0 }
  0xb9   :  { %413 = vmatpush.msra.mxu2 %v382_v50  ;;  %597 = vmatpush.msrb.mxu3 %v382_v50 }
  0xba   :  { %v199_v62 = vrot.slane %v198_v60, 1  ;;  %v201_v63 = vrot.slane %v172_v61, 4  ;;  %294 = vmatmul.f32.gmra.mxu1 %v172_v61 }
  0xbc   :  { %v200_v0 = vmax.f32 %v198_v60, %v199_v62  ;;  %v202_v1 = vmax.f32 %v172_v61, %v201_v63 }
  0xbe   :  { %v203_v4 = vrot.slane %v202_v1, 2  ;;  %v238_v6 = vsel %vm237_vm3, %v200_v0, %v236_v58 }
  0xbf   :  { %v159_v7 = vpop.f32.mrf.mxu0 }
  0xc0   :  { %v204_v8 = vmax.f32 %v202_v1, %v203_v4  ;;  %v173_v9 = vmax.f32 %v159_v7, 0.0 }
  0xc2   :  { %v205_v11 = vrot.slane %v204_v8, 1  ;;  %v207_v12 = vrot.slane %v173_v9, 4  ;;  %297 = vmatmul.f32.gmra.mxu1 %v173_v9 }
  0xc4   :  { %v206_v14 = vmax.f32 %v204_v8, %v205_v11  ;;  %v208_v15 = vmax.f32 %v173_v9, %v207_v12 }
  0xc6   :  { %v209_v17 = vrot.slane %v208_v15, 2  ;;  %v240_v19 = vsel %vm239_vm4, %v206_v14, %v238_v6 }
  0xc7   :  { %v162_v20 = vpop.f32.mrf.mxu0 }
  0xc8   :  { %v210_v21 = vmax.f32 %v208_v15, %v209_v17  ;;  %v174_v22 = vmax.f32 %v162_v20, 0.0 }
  0xca   :  { %v211_v24 = vrot.slane %v210_v21, 1  ;;  %v213_v25 = vrot.slane %v174_v22, 4  ;;  %300 = vmatmul.f32.vlgmr.msra.gmra.mxu3 %v174_v22 }
  0xcc   :  { %v212_v27 = vmax.f32 %v210_v21, %v211_v24  ;;  %v214_v28 = vmax.f32 %v174_v22, %v213_v25 }
  0xce   :  { %v215_v30 = vrot.slane %v214_v28, 2  ;;  %v242_v32 = vsel %vm241_vm5, %v212_v27, %v240_v19 }
  0xcf   :  { %v165_v33 = vpop.f32.mrf.mxu0 }
  0xd0   :  { %v216_v34 = vmax.f32 %v214_v28, %v215_v30  ;;  %v175_v35 = vmax.f32 %v165_v33, 0.0 }
  0xd2   :  { %v217_v37 = vrot.slane %v216_v34, 1  ;;  %v219_v38 = vrot.slane %v175_v35, 4  ;;  %303 = vmatmul.f32.gmra.mxu3 %v175_v35 }
  0xd4   :  { %v218_v40 = vmax.f32 %v216_v34, %v217_v37  ;;  %v220_v41 = vmax.f32 %v175_v35, %v219_v38 }
  0xd6   :  { %v221_v43 = vrot.slane %v220_v41, 2  ;;  %v244_v44 = vsel %vm243_vm6, %v218_v40, %v242_v32 }
  0xd8   :  { %v222_v45 = vmax.f32 %v220_v41, %v221_v43 }
  0xda   :  { %v223_v46 = vrot.slane %v222_v45, 1 }
  0xdc   :  { %v224_v47 = vmax.f32 %v222_v45, %v223_v46 }
  0xde   :  { %v774_v48 = vsel %vm245_vm7, %v224_v47, %v244_v44 }
 0x117   :  { %v283_v51 = vpop.f32.mrf.mxu1 }
 0x118   :  { %v307_v52 = vmax.f32 %v283_v51, 0.0 }
 0x11a   :  { %v316_v53 = vrot.slane %v307_v52, 4  ;;  %414 = vmatmul.f32.vlgmr.msra.gmra.mxu2 %v307_v52 }
 0x11c   :  { %v317_v54 = vmax.f32 %v307_v52, %v316_v53 }
 0x11e   :  { %v318_v56 = vrot.slane %v317_v54, 2 }
 0x11f   :  { %v286_v55 = vpop.f32.mrf.mxu1 }
 0x120   :  { %v308_v57 = vmax.f32 %v286_v55, 0.0  ;;  %v319_v59 = vmax.f32 %v317_v54, %v318_v56 }
 0x122   :  { %v322_v58 = vrot.slane %v308_v57, 4  ;;  %417 = vmatmul.f32.gmra.mxu2 %v308_v57  ;;  %v320_v63 = vrot.slane %v319_v59, 1 }
 0x124   :  { %v323_v60 = vmax.f32 %v308_v57, %v322_v58  ;;  %v321_v4 = vmax.f32 %v319_v59, %v320_v63  ;;  %v248_v59 = vmax.f32 %v774_v48, 0.0 }
 0x126   :  { %v324_v61 = vrot.slane %v323_v60, 2 }
 0x127   :  { %v289_v62 = vpop.f32.mrf.mxu1 }
 0x128   :  { %v325_v0 = vmax.f32 %v323_v60, %v324_v61  ;;  %v309_v1 = vmax.f32 %v289_v62, 0.0 }
 0x12a   :  { %v326_v2 = vrot.slane %v325_v0, 1  ;;  %v328_v3 = vrot.slane %v309_v1, 4  ;;  %420 = vmatmul.f32.gmra.mxu2 %v309_v1 }
 0x12c   :  { %v327_v5 = vmax.f32 %v325_v0, %v326_v2  ;;  %v329_v6 = vmax.f32 %v309_v1, %v328_v3 }
 0x12e   :  { %v330_v7 = vrot.slane %v329_v6, 2  ;;  %v372_v8 = vsel %vm233_vm1, %v327_v5, %v321_v4 }
 0x12f   :  { %v292_v9 = vpop.f32.mrf.mxu1 }
 0x130   :  { %v331_v10 = vmax.f32 %v329_v6, %v330_v7  ;;  %v310_v11 = vmax.f32 %v292_v9, 0.0 }
 0x132   :  { %v332_v12 = vrot.slane %v331_v10, 1  ;;  %v334_v13 = vrot.slane %v310_v11, 4  ;;  %423 = vmatmul.f32.gmra.mxu2 %v310_v11 }
 0x134   :  { %v333_v14 = vmax.f32 %v331_v10, %v332_v12  ;;  %v335_v15 = vmax.f32 %v310_v11, %v334_v13 }
 0x136   :  { %v336_v16 = vrot.slane %v335_v15, 2  ;;  %v373_v17 = vsel %vm235_vm2, %v333_v14, %v372_v8 }
 0x137   :  { %v295_v18 = vpop.f32.mrf.mxu1 }
 0x138   :  { %v337_v19 = vmax.f32 %v335_v15, %v336_v16  ;;  %v311_v20 = vmax.f32 %v295_v18, 0.0 }
 0x13a   :  { %v338_v21 = vrot.slane %v337_v19, 1  ;;  %v340_v22 = vrot.slane %v311_v20, 4  ;;  %426 = vmatmul.f32.gmra.mxu2 %v311_v20 }
 0x13c   :  { %v339_v23 = vmax.f32 %v337_v19, %v338_v21  ;;  %v341_v24 = vmax.f32 %v311_v20, %v340_v22 }
 0x13e   :  { %v342_v25 = vrot.slane %v341_v24, 2  ;;  %v374_v26 = vsel %vm237_vm3, %v339_v23, %v373_v17 }
 0x13f   :  { %v298_v27 = vpop.f32.mrf.mxu1 }
 0x140   :  { %v343_v28 = vmax.f32 %v341_v24, %v342_v25  ;;  %v312_v29 = vmax.f32 %v298_v27, 0.0 }
 0x142   :  { %v344_v30 = vrot.slane %v343_v28, 1  ;;  %v346_v31 = vrot.slane %v312_v29, 4  ;;  %429 = vmatmul.f32.gmra.mxu2 %v312_v29 }
 0x144   :  { %v345_v32 = vmax.f32 %v343_v28, %v344_v30  ;;  %v347_v33 = vmax.f32 %v312_v29, %v346_v31 }
 0x146   :  { %v348_v34 = vrot.slane %v347_v33, 2  ;;  %v375_v35 = vsel %vm239_vm4, %v345_v32, %v374_v26 }
 0x148   :  { %v349_v36 = vmax.f32 %v347_v33, %v348_v34 }
 0x14a   :  { %v350_v37 = vrot.slane %v349_v36, 1 }
 0x14c   :  { %v351_v38 = vmax.f32 %v349_v36, %v350_v37 }
 0x14d   :  { %v301_v39 = vpop.f32.mrf.mxu3 }
 0x14e   :  { %v313_v40 = vmax.f32 %v301_v39, 0.0  ;;  %v376_v41 = vsel %vm241_vm5, %v351_v38, %v375_v35 }
 0x150   :  { %v352_v42 = vrot.slane %v313_v40, 4  ;;  %432 = vmatmul.f32.vlgmr.msrb.gmra.mxu3 %v313_v40 }
 0x152   :  { %v353_v43 = vmax.f32 %v313_v40, %v352_v42 }
 0x154   :  { %v354_v44 = vrot.slane %v353_v43, 2 }
 0x155   :  { %v304_v45 = vpop.f32.mrf.mxu3 }
 0x156   :  { %v355_v46 = vmax.f32 %v353_v43, %v354_v44  ;;  %v314_v47 = vmax.f32 %v304_v45, 0.0 }
 0x158   :  { %v356_v49 = vrot.slane %v355_v46, 1  ;;  %v358_v50 = vrot.slane %v314_v47, 4  ;;  %435 = vmatmul.f32.gmra.mxu3 %v314_v47 }
 0x15a   :  { %v357_v51 = vmax.f32 %v355_v46, %v356_v49  ;;  %v359_v52 = vmax.f32 %v314_v47, %v358_v50 }
 0x15c   :  { %v360_v53 = vrot.slane %v359_v52, 2  ;;  %v377_v54 = vsel %vm243_vm6, %v357_v51, %v376_v41 }
 0x15e   :  { %v361_v55 = vmax.f32 %v359_v52, %v360_v53 }
 0x160   :  { %v362_v56 = vrot.slane %v361_v55, 1 }
 0x162   :  { %v363_v57 = vmax.f32 %v361_v55, %v362_v56 }
 0x164   :  { %v378_v58 = vsel %vm245_vm7, %v363_v57, %v377_v54 }
 0x165   :  { %v380_v60 = vmax.f32 %v378_v58, 0.0 }
 0x167   :  { %v784_v61 = vadd.f32 %v380_v60, %v248_v59 }
 0x19d   :  { %v415_v62 = vpop.f32.mrf.mxu2 }
 0x19e   :  { %v439_v6 = vmax.f32 %v415_v62, 0.0 }
 0x1a0   :  { %v448_v12 = vrot.slane %v439_v6, 4 }
 0x1a2   :  { %v449_v17 = vmax.f32 %v439_v6, %v448_v12 }
 0x1a4   :  { %v450_v25 = vrot.slane %v449_v17, 2 }
 0x1a5   :  { %v418_v63 = vpop.f32.mrf.mxu2 }
 0x1a6   :  { %v440_v3 = vmax.f32 %v418_v63, 0.0  ;;  %v451_v33 = vmax.f32 %v449_v17, %v450_v25 }
 0x1a8   :  { %v454_v9 = vrot.slane %v440_v3, 4  ;;  %v452_v43 = vrot.slane %v451_v33, 1 }
 0x1aa   :  { %v455_v14 = vmax.f32 %v440_v3, %v454_v9  ;;  %v453_v53 = vmax.f32 %v451_v33, %v452_v43 }
 0x1ac   :  { %v456_v21 = vrot.slane %v455_v14, 2 }
 0x1ad   :  { %v421_v0 = vpop.f32.mrf.mxu2 }
 0x1ae   :  { %v441_v4 = vmax.f32 %v421_v0, 0.0  ;;  %v457_v29 = vmax.f32 %v455_v14, %v456_v21 }
 0x1b0   :  { %v460_v11 = vrot.slane %v441_v4, 4  ;;  %v458_v38 = vrot.slane %v457_v29, 1 }
 0x1b2   :  { %v461_v16 = vmax.f32 %v441_v4, %v460_v11  ;;  %v459_v47 = vmax.f32 %v457_v29, %v458_v38 }
 0x1b4   :  { %v462_v24 = vrot.slane %v461_v16, 2  ;;  %v504_v57 = vsel %vm233_vm1, %v459_v47, %v453_v53 }
 0x1b5   :  { %v424_v1 = vpop.f32.mrf.mxu2 }
 0x1b6   :  { %v442_v7 = vmax.f32 %v424_v1, 0.0  ;;  %v463_v32 = vmax.f32 %v461_v16, %v462_v24 }
 0x1b8   :  { %v466_v13 = vrot.slane %v442_v7, 4  ;;  %v464_v41 = vrot.slane %v463_v32, 1 }
 0x1ba   :  { %v467_v18 = vmax.f32 %v442_v7, %v466_v13  ;;  %v465_v51 = vmax.f32 %v463_v32, %v464_v41  ;;  %v604_v7 = vld [vmem:[%s804_s4] ss:$0 sm:$0xff] }
 0x1bc   :  { %v468_v26 = vrot.slane %v467_v18, 2  ;;  %v505_v60 = vsel %vm235_vm2, %v465_v51, %v504_v57 }
 0x1bd   :  { %v427_v2 = vpop.f32.mrf.mxu2 }
 0x1be   :  { %v443_v8 = vmax.f32 %v427_v2, 0.0  ;;  %v469_v34 = vmax.f32 %v467_v18, %v468_v26 }
 0x1c0   :  { %v472_v48 = vrot.slane %v443_v8, 4  ;;  %v470_v44 = vrot.slane %v469_v34, 1 }
 0x1c2   :  { %v473_v19 = vmax.f32 %v443_v8, %v472_v48  ;;  %v471_v54 = vmax.f32 %v469_v34, %v470_v44 }
 0x1c4   :  { %v474_v28 = vrot.slane %v473_v19, 2  ;;  %v506_v63 = vsel %vm237_vm3, %v471_v54, %v505_v60 }
 0x1c5   :  { %v430_v5 = vpop.f32.mrf.mxu2 }
 0x1c6   :  { %v444_v10 = vmax.f32 %v430_v5, 0.0  ;;  %v475_v36 = vmax.f32 %v473_v19, %v474_v28 }
 0x1c8   :  { %v478_v15 = vrot.slane %v444_v10, 4  ;;  %v476_v46 = vrot.slane %v475_v36, 1 }
 0x1ca   :  { %v479_v22 = vmax.f32 %v444_v10, %v478_v15  ;;  %v477_v56 = vmax.f32 %v475_v36, %v476_v46 }
 0x1cc   :  { %v480_v30 = vrot.slane %v479_v22, 2  ;;  %v507_v1 = vsel %vm239_vm4, %v477_v56, %v506_v63 }
 0x1ce   :  { %v481_v39 = vmax.f32 %v479_v22, %v480_v30 }
 0x1d0   :  { %v482_v49 = vrot.slane %v481_v39, 1 }
 0x1d2   :  { %v483_v58 = vmax.f32 %v481_v39, %v482_v49 }
 0x1d3   :  { %v433_v20 = vpop.f32.mrf.mxu3 }
 0x1d4   :  { %v445_v23 = vmax.f32 %v433_v20, 0.0  ;;  %v508_v3 = vsel %vm241_vm5, %v483_v58, %v507_v1 }
 0x1d6   :  { %v484_v27 = vrot.slane %v445_v23, 4 }
 0x1d8   :  { %v485_v31 = vmax.f32 %v445_v23, %v484_v27 }
 0x1da   :  { %v486_v35 = vrot.slane %v485_v31, 2 }
 0x1db   :  { %v436_v37 = vpop.f32.mrf.mxu3 }
 0x1dc   :  { %v446_v40 = vmax.f32 %v436_v37, 0.0  ;;  %v487_v42 = vmax.f32 %v485_v31, %v486_v35 }
 0x1de   :  { %v490_v45 = vrot.slane %v446_v40, 4  ;;  %v488_v52 = vrot.slane %v487_v42, 1 }
 0x1e0   :  { %v491_v50 = vmax.f32 %v446_v40, %v490_v45  ;;  %v489_v62 = vmax.f32 %v487_v42, %v488_v52 }
 0x1e2   :  { %v492_v55 = vrot.slane %v491_v50, 2  ;;  %v509_v4 = vsel %vm243_vm6, %v489_v62, %v508_v3 }
 0x1e4   :  { %v493_v59 = vmax.f32 %v491_v50, %v492_v55 }
 0x1e6   :  { %v494_v0 = vrot.slane %v493_v59, 1 }
 0x1e8   :  { %v495_v2 = vmax.f32 %v493_v59, %v494_v0 }
 0x1ea   :  { %v510_v5 = vsel %vm245_vm7, %v495_v2, %v509_v4 }
 0x1eb   :  { %v512_v6 = vmax.f32 %v510_v5, 0.0 }
 0x1ed   :  { %v521_v8 = vadd.f32 %v784_v61, %v512_v6 }
 0x1ef   :  { %v526_v9 = vmul.f32 %v604_v7, %v521_v8 }
 0x1f1   :  { %527 = vadd.xlane.f32.xlu0 %v526_v9 }
 0x264   :  { %v528_v10 = vpop.xlane.xlu0 %527 }
 0x265   :  { %v565_v11 = vmul.f32 -1.442695, %v528_v10 }
 0x267   :  { %605 = vpow2.f32 %v565_v11 }
 0x26d   :  { %v606_v12 = vpop.eup %605 }
 0x26e   :  { %v532_v13 = vadd.f32 1.0, %v606_v12 }
 0x270   :  { %607 = vrcp.f32 %v532_v13  ;;  %v544_v16 = vand.u32 2147483648, %v532_v13  ;;  %v542_v18 = vand.u32 2147483647, %v532_v13  ;;  %vm538_vm9 = vweird.f32 %v532_v13 }
 0x272   :  { %v545_v20 = vor.u32 1.1754944e-38, %v544_v16  ;;  %vm543_vm12 = vcmp.eq.f32.partialorder %v542_v18, 8.507059e+37 }
 0x276   :  { %v608_v48 = vpop.eup %607 }
 0x277   :  { %v534_v14 = vmul.f32 %v608_v48, %v532_v13  ;;  %vm539_vm8 = vweird.f32 %v608_v48 }
 0x278   :  { %vm540_vm10 = vmor %vm538_vm9, %vm539_vm8 }
 0x279   :  { %v535_v15 = vsub.f32 1.0, %v534_v14 }
 0x27b   :  { %v536_v17 = vmul.f32 %v608_v48, %v535_v15 }
 0x27d   :  { %v537_v19 = vadd.f32 %v608_v48, %v536_v17 }
 0x27f   :  { %v541_v61 = vsel %vm540_vm10, %v608_v48, %v537_v19 }
 0x280   :  { %v546_v21 = vsel %vm543_vm12, %v545_v20, %v541_v61 }
 0x281   :  { %549 = vst.msk [vmem:[%s805_s5] sm:$0xff] %vm548_vm11, %v546_v21 }
 0x282   :  { %554 = vsyncpa [#allocation6], 1 }
 0x283   :  { %555 = vsyncpa [#allocation8], 1 }
 0x284   :  { %556 = vsyncpa [#allocation11], 1 }

</bundles_post_ra>
